<compile_context>
chip_gen: v6e
topology: v6e:2x2x1
jax: 0.10.0
libtpu: 0.0.40
codegen_flags: <defaults>
</compile_context>

<pallas_src>
import functools

import jax
import jax.numpy as jnp
from jax.experimental import pallas as pl
from jax.experimental.pallas import tpu as pltpu


def _round_up(x, m):
    return (x + m - 1) // m * m


def _vmem_limit_bytes():
    # Generation-aware scoped-VMEM budget (review: raise to ~64 MiB on
    # v5e/v6e's 128 MiB physical VMEM, cap ~48 MiB on v7x's 64 MiB).
    try:
        phys = pltpu.get_tpu_info().vmem_capacity_bytes
    except Exception:  # non-TPU backend / interpret fallback
        phys = 128 * 1024 * 1024
    return int(min(64 * 1024 * 1024, phys * 3 // 4))


# ------------------------------ Pallas kernel --------------------------------


def _conv3x3_relu_kernel(x_ref, w_ref, b_ref, o_ref, *, taps, m_rows, k_fill):
    # x_ref: (P*L, Cin)   bf16  flattened zero-padded phase slab of ONE image
    # w_ref: (Kpad, TC)   bf16  folded 3x3 weights (VMEM-resident over grid)
    # b_ref: (1, TC)      f32   bias
    # o_ref: (m_rows, TC) bf16  extended output rows (Ho x Wph), lane-dense
    #
    # In-kernel im2col: each tap is a contiguous, unit-stride m_rows-long
    # window of the flattened slab (static offset), concatenated along the
    # contraction dim -> ONE deep-K MXU matmul with fused bias + ReLU.
    cols = [x_ref[pl.ds(t, m_rows), :] for t in taps]
    if k_fill:
        cols.append(jnp.zeros((m_rows, k_fill), cols[0].dtype))
    patches = jnp.concatenate(cols, axis=-1)                     # (m_rows, Kpad)
    acc = jnp.dot(patches, w_ref[...], preferred_element_type=jnp.float32)
    o_ref[...] = jnp.maximum(acc + b_ref[...], 0.0).astype(o_ref.dtype)


def _conv3x3_relu(xflat, wmat, bias, *, taps, m_rows, tc):
    n, plen, cin = xflat.shape
    kpad, cp = wmat.shape
    k_fill = kpad - len(taps) * cin
    kernel = functools.partial(
        _conv3x3_relu_kernel, taps=taps, m_rows=m_rows, k_fill=k_fill)
    return pl.pallas_call(
        kernel,
        out_shape=jax.ShapeDtypeStruct((n, m_rows, cp), jnp.bfloat16),
        grid=(n, cp // tc),
        in_specs=[
            # Full flattened image per step; index constant across the
            # (usually size-1) Cout axis -> no re-DMA.
            pl.BlockSpec((None, plen, cin), lambda i, j: (i, 0, 0)),
            # Weights/bias: constant block index when cp == tc -> fetched once
            # and kept VMEM-resident for the whole grid.
            pl.BlockSpec((kpad, tc), lambda i, j: (0, j)),
            pl.BlockSpec((1, tc), lambda i, j: (0, j)),
        ],
        out_specs=pl.BlockSpec((None, m_rows, tc), lambda i, j: (i, 0, j)),
        compiler_params=pltpu.CompilerParams(
            dimension_semantics=("parallel", "parallel"),
            vmem_limit_bytes=_vmem_limit_bytes(),
        ),
    )(xflat, wmat, bias)


# ------------------------------ BlockQ forward --------------------------------


def block_q_forward_nhwc(x_nhwc, weight_hwio, bias, *, stride=1):
    """ReLU(Conv2d(Cin, Cout, 3, stride, padding=1)) on an NHWC input.

    Returns (N, Ho, Wo, Cout) in bf16 so stacked BlockQ layers chain with no
    NCHW<->NHWC transposes and no f32 intermediates.
    """
    N, H, W, Cin = x_nhwc.shape
    Cout = weight_hwio.shape[-1]
    s = int(stride)
    Ho = (H - 1) // s + 1
    Wo = (W - 1) // s + 1
    # Extended per-phase geometry: 2 junk output columns per row (window wrap)
    # plus a spare bottom row make every 3x3 tap a contiguous window.
    Hph, Wph = Ho + 3, Wo + 2
    L = Hph * Wph
    m_rows = Ho * Wph

    # ~1x activation traffic: zero-padded canvas, split into s*s unit-stride
    # phases, flattened per image.  (Replaces the old 9x HBM im2col.)
    canvas = jnp.zeros((N, s * Hph, s * Wph, Cin), jnp.bfloat16)
    canvas = canvas.at[:, 1:1 + H, 1:1 + W, :].set(x_nhwc.astype(jnp.bfloat16))
    phases = [canvas[:, a::s, b::s, :] for a in range(s) for b in range(s)]
    xflat = jnp.stack(phases, axis=1).reshape(N, s * s * L, Cin)

    # Tap (dy, dx) -> phase (dy%s, dx%s), row offset dy//s, col offset dx//s.
    taps = tuple(((dy % s) * s + (dx % s)) * L + (dy // s) * Wph + (dx // s)
                 for dy in range(3) for dx in range(3))

    # Folded weights: K = 9*Cin padded to a multiple of 16 (bf16 sublanes),
    # Cout padded to a multiple of 128 (lane-dense stores).
    K = 9 * Cin
    Kpad = _round_up(K, 16)
    Cp = _round_up(Cout, 128)
    wmat = weight_hwio.reshape(K, Cout).astype(jnp.bfloat16)
    wmat = jnp.pad(wmat, ((0, Kpad - K), (0, Cp - Cout)))
    b = jnp.pad(bias.reshape(1, Cout).astype(jnp.float32),
                ((0, 0), (0, Cp - Cout)))

    # Keep the whole (padded) Cout resident when the weight is small (true for
    # every layer here); only tile Cout for very wide layers.
    if Kpad * Cp * 2 <= 8 * 1024 * 1024:
        tc = Cp
    elif Cp % 256 == 0:
        tc = 256
    else:
        tc = 128

    out = _conv3x3_relu(xflat, wmat, b, taps=taps, m_rows=m_rows, tc=tc)
    # Drop the junk columns and padded channels (one fused XLA slice).
    return out.reshape(N, Ho, Wph, Cp)[:, :, :Wo, :Cout]


def block_q_forward(x_nchw, weight_hwio, bias, *, stride=1):
    """PyTorch-equivalent BlockQ.forward: NCHW f32 in -> NCHW f32 out."""
    x = jnp.transpose(x_nchw, (0, 2, 3, 1))
    y = block_q_forward_nhwc(x, weight_hwio, bias, stride=stride)
    return jnp.transpose(y, (0, 3, 1, 2)).astype(jnp.float32)


# ----------------------------------- main -------------------------------------

if __name__ == "__main__":
    key = jax.random.PRNGKey(0)
    kx, kw1, kb1, kw2, kb2 = jax.random.split(key, 5)

    # BlockQ(4, 32, std=1) then BlockQ(32, 64, std=2), on (2, 4, 16, 16).
    N, Cin, H, W = 2, 4, 16, 16
    x = jax.random.normal(kx, (N, Cin, H, W), jnp.float32)

    w1 = jax.random.normal(kw1, (3, 3, Cin, 32), jnp.float32) * jnp.sqrt(2.0 / (9 * Cin))
    b1 = 0.01 * jax.random.normal(kb1, (32,), jnp.float32)
    w2 = jax.random.normal(kw2, (3, 3, 32, 64), jnp.float32) * jnp.sqrt(2.0 / (9 * 32))
    b2 = 0.01 * jax.random.normal(kb2, (64,), jnp.float32)

    @jax.jit
    def two_blocks(xin, wa, ba, wb, bb):
        # Chained NHWC/bf16 path: one transpose in, one transpose out.
        xh = jnp.transpose(xin, (0, 2, 3, 1))
        h = block_q_forward_nhwc(xh, wa, ba, stride=1)        # (N,16,16,32) bf16
        y = block_q_forward_nhwc(h, wb, bb, stride=2)         # (N, 8, 8,64) bf16
        return h, jnp.transpose(y, (0, 3, 1, 2)).astype(jnp.float32)

    h1, y2 = jax.block_until_ready(two_blocks(x, w1, b1, w2, b2))
    assert h1.shape == (N, H, W, 32)
    assert y2.shape == (N, 64, H // 2, W // 2)

    # PyTorch-equivalent single-layer NCHW API.
    y1_nchw = jax.block_until_ready(
        jax.jit(lambda a, wt, bs: block_q_forward(a, wt, bs, stride=1))(x, w1, b1))
    assert y1_nchw.shape == (N, 32, H, W)

    # Full-f32 XLA reference chain (kernel runs bf16 -> loose tolerances).
    def ref(x_nhwc, wt, bs, s):
        y = jax.lax.conv_general_dilated(
            x_nhwc, wt, window_strides=(s, s), padding=((1, 1), (1, 1)),
            dimension_numbers=("NHWC", "HWIO", "NHWC"))
        return jnp.maximum(y + bs, 0.0)

    r1 = ref(jnp.transpose(x, (0, 2, 3, 1)), w1, b1, 1)
    r2 = jnp.transpose(ref(r1, w2, b2, 2), (0, 3, 1, 2))

    err1 = float(jnp.max(jnp.abs(h1.astype(jnp.float32) - r1)))
    err1n = float(jnp.max(jnp.abs(y1_nchw - jnp.transpose(r1, (0, 3, 1, 2)))))
    err2 = float(jnp.max(jnp.abs(y2 - r2)))
    assert jnp.allclose(h1.astype(jnp.float32), r1, atol=1e-1, rtol=1e-1), err1
    assert jnp.allclose(y1_nchw, jnp.transpose(r1, (0, 3, 1, 2)),
                        atol=1e-1, rtol=1e-1), err1n
    assert jnp.allclose(y2, r2, atol=2.5e-1, rtol=1e-1), err2
    print("KERNEL_OK")
</pallas_src>

<mosaic_0001>
module attributes {stable_mosaic.version = 11 : i64} {
  func.func @_conv3x3_relu_kernel(%arg0: i32, %arg1: i32, %arg2: memref<1x342x4xbf16, #tpu.memory_space<vmem>>, %arg3: memref<48x128xbf16, #tpu.memory_space<vmem>>, %arg4: memref<1x128xf32, #tpu.memory_space<vmem>>, %arg5: memref<1x288x128xbf16, #tpu.memory_space<vmem>>) attributes {dimension_semantics = [#tpu.dimension_semantics<parallel>, #tpu.dimension_semantics<parallel>], iteration_bounds = array<i64: 2, 1>, scalar_prefetch = 0 : i64, scratch_operands = 0 : i64, tpu.core_type = #tpu.core_type<tc>, window_params = [{transform_indices = @transform_0, window_bounds = array<i64: 1, 342, 4>}, {transform_indices = @transform_1, window_bounds = array<i64: 48, 128>}, {transform_indices = @transform_2, window_bounds = array<i64: 1, 128>}, {transform_indices = @transform_3, window_bounds = array<i64: 1, 288, 128>}]} {
    %c0 = arith.constant 0 : index
    %c0_0 = arith.constant 0 : index
    %c0_1 = arith.constant 0 : index
    %0 = vector.load %arg2[%c0, %c0_0, %c0_1] : memref<1x342x4xbf16, #tpu.memory_space<vmem>>, vector<1x288x4xbf16>
    %1 = vector.shape_cast %0 : vector<1x288x4xbf16> to vector<288x4xbf16>
    %c0_2 = arith.constant 0 : index
    %c1 = arith.constant 1 : index
    %c0_3 = arith.constant 0 : index
    %2 = vector.load %arg2[%c0_2, %c1, %c0_3] : memref<1x342x4xbf16, #tpu.memory_space<vmem>>, vector<1x288x4xbf16>
    %3 = vector.shape_cast %2 : vector<1x288x4xbf16> to vector<288x4xbf16>
    %c0_4 = arith.constant 0 : index
    %c2 = arith.constant 2 : index
    %c0_5 = arith.constant 0 : index
    %4 = vector.load %arg2[%c0_4, %c2, %c0_5] : memref<1x342x4xbf16, #tpu.memory_space<vmem>>, vector<1x288x4xbf16>
    %5 = vector.shape_cast %4 : vector<1x288x4xbf16> to vector<288x4xbf16>
    %c0_6 = arith.constant 0 : index
    %c18 = arith.constant 18 : index
    %c0_7 = arith.constant 0 : index
    %6 = vector.load %arg2[%c0_6, %c18, %c0_7] : memref<1x342x4xbf16, #tpu.memory_space<vmem>>, vector<1x288x4xbf16>
    %7 = vector.shape_cast %6 : vector<1x288x4xbf16> to vector<288x4xbf16>
    %c0_8 = arith.constant 0 : index
    %c19 = arith.constant 19 : index
    %c0_9 = arith.constant 0 : index
    %8 = vector.load %arg2[%c0_8, %c19, %c0_9] : memref<1x342x4xbf16, #tpu.memory_space<vmem>>, vector<1x288x4xbf16>
    %9 = vector.shape_cast %8 : vector<1x288x4xbf16> to vector<288x4xbf16>
    %c0_10 = arith.constant 0 : index
    %c20 = arith.constant 20 : index
    %c0_11 = arith.constant 0 : index
    %10 = vector.load %arg2[%c0_10, %c20, %c0_11] : memref<1x342x4xbf16, #tpu.memory_space<vmem>>, vector<1x288x4xbf16>
    %11 = vector.shape_cast %10 : vector<1x288x4xbf16> to vector<288x4xbf16>
    %c0_12 = arith.constant 0 : index
    %c36 = arith.constant 36 : index
    %c0_13 = arith.constant 0 : index
    %12 = vector.load %arg2[%c0_12, %c36, %c0_13] : memref<1x342x4xbf16, #tpu.memory_space<vmem>>, vector<1x288x4xbf16>
    %13 = vector.shape_cast %12 : vector<1x288x4xbf16> to vector<288x4xbf16>
    %c0_14 = arith.constant 0 : index
    %c37 = arith.constant 37 : index
    %c0_15 = arith.constant 0 : index
    %14 = vector.load %arg2[%c0_14, %c37, %c0_15] : memref<1x342x4xbf16, #tpu.memory_space<vmem>>, vector<1x288x4xbf16>
    %15 = vector.shape_cast %14 : vector<1x288x4xbf16> to vector<288x4xbf16>
    %c0_16 = arith.constant 0 : index
    %c38 = arith.constant 38 : index
    %c0_17 = arith.constant 0 : index
    %16 = vector.load %arg2[%c0_16, %c38, %c0_17] : memref<1x342x4xbf16, #tpu.memory_space<vmem>>, vector<1x288x4xbf16>
    %17 = vector.shape_cast %16 : vector<1x288x4xbf16> to vector<288x4xbf16>
    %cst = arith.constant 0.000000e+00 : bf16
    %18 = vector.broadcast %cst : bf16 to vector<288x12xbf16>
    %19 = tpu.concatenate %1, %3, %5, %7, %9, %11, %13, %15, %17, %18 in 1 : vector<288x4xbf16>, vector<288x4xbf16>, vector<288x4xbf16>, vector<288x4xbf16>, vector<288x4xbf16>, vector<288x4xbf16>, vector<288x4xbf16>, vector<288x4xbf16>, vector<288x4xbf16>, vector<288x12xbf16> -> vector<288x48xbf16>
    %c0_18 = arith.constant 0 : index
    %c0_19 = arith.constant 0 : index
    %20 = vector.load %arg3[%c0_18, %c0_19] : memref<48x128xbf16, #tpu.memory_space<vmem>>, vector<48x128xbf16>
    %cst_20 = arith.constant dense<0.000000e+00> : vector<288x128xf32>
    %21 = tpu.matmul %19, %20, %cst_20 {dimension_numbers = #tpu.dot_dimension_numbers<[1], [0], [0], [1], [0, 0, 1, 1], [], []>} : vector<288x48xbf16>, vector<48x128xbf16>, vector<288x128xf32> -> vector<288x128xf32>
    %c0_21 = arith.constant 0 : index
    %c0_22 = arith.constant 0 : index
    %22 = vector.load %arg4[%c0_21, %c0_22] : memref<1x128xf32, #tpu.memory_space<vmem>>, vector<1x128xf32>
    %23 = vector.broadcast %22 : vector<1x128xf32> to vector<288x128xf32>
    %24 = arith.addf %21, %23 : vector<288x128xf32>
    %cst_23 = arith.constant 0.000000e+00 : f32
    %25 = vector.broadcast %cst_23 : f32 to vector<288x128xf32>
    %26 = arith.maximumf %24, %25 : vector<288x128xf32>
    %27 = arith.truncf %26 : vector<288x128xf32> to vector<288x128xbf16>
    %c0_24 = arith.constant 0 : index
    %c0_25 = arith.constant 0 : index
    %c0_26 = arith.constant 0 : index
    %28 = vector.load %arg5[%c0_24, %c0_25, %c0_26] : memref<1x288x128xbf16, #tpu.memory_space<vmem>>, vector<1x288x128xbf16>
    %29 = vector.shape_cast %28 : vector<1x288x128xbf16> to vector<288x128xbf16>
    %30 = vector.shape_cast %27 : vector<288x128xbf16> to vector<1x288x128xbf16>
    tpu.vector_store %arg5[%c0_24, %c0_25, %c0_26], %30 {strides = array<i32>} : memref<1x288x128xbf16, #tpu.memory_space<vmem>>, vector<1x288x128xbf16>,
    return
  }
  func.func @transform_0(%arg0: i32, %arg1: i32) -> (i32, i32, i32) {
    %c0_i32 = arith.constant 0 : i32
    %c0_i32_0 = arith.constant 0 : i32
    %c0_i32_1 = arith.constant 0 : i32
    return %arg0, %c0_i32, %c0_i32_0 : i32, i32, i32
  }
  func.func @transform_1(%arg0: i32, %arg1: i32) -> (i32, i32) {
    %c0_i32 = arith.constant 0 : i32
    %c0_i32_0 = arith.constant 0 : i32
    return %c0_i32, %arg1 : i32, i32
  }
  func.func @transform_2(%arg0: i32, %arg1: i32) -> (i32, i32) {
    %c0_i32 = arith.constant 0 : i32
    %c0_i32_0 = arith.constant 0 : i32
    return %c0_i32, %arg1 : i32, i32
  }
  func.func @transform_3(%arg0: i32, %arg1: i32) -> (i32, i32, i32) {
    %c0_i32 = arith.constant 0 : i32
    %c0_i32_0 = arith.constant 0 : i32
    return %arg0, %c0_i32, %arg1 : i32, i32, i32
  }
}

module attributes {stable_mosaic.version = 11 : i64} {
  func.func @_conv3x3_relu_kernel(%arg0: i32, %arg1: i32, %arg2: memref<1x440x32xbf16, #tpu.memory_space<vmem>>, %arg3: memref<288x128xbf16, #tpu.memory_space<vmem>>, %arg4: memref<1x128xf32, #tpu.memory_space<vmem>>, %arg5: memref<1x80x128xbf16, #tpu.memory_space<vmem>>) attributes {dimension_semantics = [#tpu.dimension_semantics<parallel>, #tpu.dimension_semantics<parallel>], iteration_bounds = array<i64: 2, 1>, scalar_prefetch = 0 : i64, scratch_operands = 0 : i64, tpu.core_type = #tpu.core_type<tc>, window_params = [{transform_indices = @transform_0, window_bounds = array<i64: 1, 440, 32>}, {transform_indices = @transform_1, window_bounds = array<i64: 288, 128>}, {transform_indices = @transform_2, window_bounds = array<i64: 1, 128>}, {transform_indices = @transform_3, window_bounds = array<i64: 1, 80, 128>}]} {
    %c0 = arith.constant 0 : index
    %c0_0 = arith.constant 0 : index
    %c0_1 = arith.constant 0 : index
    %0 = vector.load %arg2[%c0, %c0_0, %c0_1] : memref<1x440x32xbf16, #tpu.memory_space<vmem>>, vector<1x80x32xbf16>
    %1 = vector.shape_cast %0 : vector<1x80x32xbf16> to vector<80x32xbf16>
    %c0_2 = arith.constant 0 : index
    %c110 = arith.constant 110 : index
    %c0_3 = arith.constant 0 : index
    %2 = vector.load %arg2[%c0_2, %c110, %c0_3] : memref<1x440x32xbf16, #tpu.memory_space<vmem>>, vector<1x80x32xbf16>
    %3 = vector.shape_cast %2 : vector<1x80x32xbf16> to vector<80x32xbf16>
    %c0_4 = arith.constant 0 : index
    %c1 = arith.constant 1 : index
    %c0_5 = arith.constant 0 : index
    %4 = vector.load %arg2[%c0_4, %c1, %c0_5] : memref<1x440x32xbf16, #tpu.memory_space<vmem>>, vector<1x80x32xbf16>
    %5 = vector.shape_cast %4 : vector<1x80x32xbf16> to vector<80x32xbf16>
    %c0_6 = arith.constant 0 : index
    %c220 = arith.constant 220 : index
    %c0_7 = arith.constant 0 : index
    %6 = vector.load %arg2[%c0_6, %c220, %c0_7] : memref<1x440x32xbf16, #tpu.memory_space<vmem>>, vector<1x80x32xbf16>
    %7 = vector.shape_cast %6 : vector<1x80x32xbf16> to vector<80x32xbf16>
    %c0_8 = arith.constant 0 : index
    %c330 = arith.constant 330 : index
    %c0_9 = arith.constant 0 : index
    %8 = vector.load %arg2[%c0_8, %c330, %c0_9] : memref<1x440x32xbf16, #tpu.memory_space<vmem>>, vector<1x80x32xbf16>
    %9 = vector.shape_cast %8 : vector<1x80x32xbf16> to vector<80x32xbf16>
    %c0_10 = arith.constant 0 : index
    %c221 = arith.constant 221 : index
    %c0_11 = arith.constant 0 : index
    %10 = vector.load %arg2[%c0_10, %c221, %c0_11] : memref<1x440x32xbf16, #tpu.memory_space<vmem>>, vector<1x80x32xbf16>
    %11 = vector.shape_cast %10 : vector<1x80x32xbf16> to vector<80x32xbf16>
    %c0_12 = arith.constant 0 : index
    %c10 = arith.constant 10 : index
    %c0_13 = arith.constant 0 : index
    %12 = vector.load %arg2[%c0_12, %c10, %c0_13] : memref<1x440x32xbf16, #tpu.memory_space<vmem>>, vector<1x80x32xbf16>
    %13 = vector.shape_cast %12 : vector<1x80x32xbf16> to vector<80x32xbf16>
    %c0_14 = arith.constant 0 : index
    %c120 = arith.constant 120 : index
    %c0_15 = arith.constant 0 : index
    %14 = vector.load %arg2[%c0_14, %c120, %c0_15] : memref<1x440x32xbf16, #tpu.memory_space<vmem>>, vector<1x80x32xbf16>
    %15 = vector.shape_cast %14 : vector<1x80x32xbf16> to vector<80x32xbf16>
    %c0_16 = arith.constant 0 : index
    %c11 = arith.constant 11 : index
    %c0_17 = arith.constant 0 : index
    %16 = vector.load %arg2[%c0_16, %c11, %c0_17] : memref<1x440x32xbf16, #tpu.memory_space<vmem>>, vector<1x80x32xbf16>
    %17 = vector.shape_cast %16 : vector<1x80x32xbf16> to vector<80x32xbf16>
    %18 = tpu.concatenate %1, %3, %5, %7, %9, %11, %13, %15, %17 in 1 : vector<80x32xbf16>, vector<80x32xbf16>, vector<80x32xbf16>, vector<80x32xbf16>, vector<80x32xbf16>, vector<80x32xbf16>, vector<80x32xbf16>, vector<80x32xbf16>, vector<80x32xbf16> -> vector<80x288xbf16>
    %c0_18 = arith.constant 0 : index
    %c0_19 = arith.constant 0 : index
    %19 = vector.load %arg3[%c0_18, %c0_19] : memref<288x128xbf16, #tpu.memory_space<vmem>>, vector<288x128xbf16>
    %cst = arith.constant dense<0.000000e+00> : vector<80x128xf32>
    %20 = tpu.matmul %18, %19, %cst {dimension_numbers = #tpu.dot_dimension_numbers<[1], [0], [0], [1], [0, 0, 1, 1], [], []>} : vector<80x288xbf16>, vector<288x128xbf16>, vector<80x128xf32> -> vector<80x128xf32>
    %c0_20 = arith.constant 0 : index
    %c0_21 = arith.constant 0 : index
    %21 = vector.load %arg4[%c0_20, %c0_21] : memref<1x128xf32, #tpu.memory_space<vmem>>, vector<1x128xf32>
    %22 = vector.broadcast %21 : vector<1x128xf32> to vector<80x128xf32>
    %23 = arith.addf %20, %22 : vector<80x128xf32>
    %cst_22 = arith.constant 0.000000e+00 : f32
    %24 = vector.broadcast %cst_22 : f32 to vector<80x128xf32>
    %25 = arith.maximumf %23, %24 : vector<80x128xf32>
    %26 = arith.truncf %25 : vector<80x128xf32> to vector<80x128xbf16>
    %c0_23 = arith.constant 0 : index
    %c0_24 = arith.constant 0 : index
    %c0_25 = arith.constant 0 : index
    %27 = vector.load %arg5[%c0_23, %c0_24, %c0_25] : memref<1x80x128xbf16, #tpu.memory_space<vmem>>, vector<1x80x128xbf16>
    %28 = vector.shape_cast %27 : vector<1x80x128xbf16> to vector<80x128xbf16>
    %29 = vector.shape_cast %26 : vector<80x128xbf16> to vector<1x80x128xbf16>
    tpu.vector_store %arg5[%c0_23, %c0_24, %c0_25], %29 {strides = array<i32>} : memref<1x80x128xbf16, #tpu.memory_space<vmem>>, vector<1x80x128xbf16>,
    return
  }
  func.func @transform_0(%arg0: i32, %arg1: i32) -> (i32, i32, i32) {
    %c0_i32 = arith.constant 0 : i32
    %c0_i32_0 = arith.constant 0 : i32
    %c0_i32_1 = arith.constant 0 : i32
    return %arg0, %c0_i32, %c0_i32_0 : i32, i32, i32
  }
  func.func @transform_1(%arg0: i32, %arg1: i32) -> (i32, i32) {
    %c0_i32 = arith.constant 0 : i32
    %c0_i32_0 = arith.constant 0 : i32
    return %c0_i32, %arg1 : i32, i32
  }
  func.func @transform_2(%arg0: i32, %arg1: i32) -> (i32, i32) {
    %c0_i32 = arith.constant 0 : i32
    %c0_i32_0 = arith.constant 0 : i32
    return %c0_i32, %arg1 : i32, i32
  }
  func.func @transform_3(%arg0: i32, %arg1: i32) -> (i32, i32, i32) {
    %c0_i32 = arith.constant 0 : i32
    %c0_i32_0 = arith.constant 0 : i32
    return %arg0, %c0_i32, %arg1 : i32, i32, i32
  }
}

</mosaic_0001>

<bundles_post_ra>
// kernel: two_blocks.3
= control target key start
LH: loop header
LB: loop body
LE: loop exit
PB: predicated region body
PF: predicated region fallthrough
CT: control target
= control target key end

     0   :  { %s1549_s12 = smov 0   ;;  %s1551_s13 = smov 0   ;;  %s1965_s0 = inlined_call_operand.vmem [shape: bf16[2,440,32], index: 0, kind: input, shape index: {}]   ;;  %s1966_s1 = inlined_call_operand.vmem [shape: bf16[288,128], index: 1, kind: input, shape index: {}]   ;;  %s1967_s2 = inlined_call_operand.vmem [shape: f32[1,128], index: 2, kind: input, shape index: {}]   ;;  %s1968_s3 = inlined_call_operand.vmem [shape: bf16[2,80,128], index: 3, kind: output, shape index: {}]  }
   0x1   :  { %s1553_s14 = smov 0  }
   0x2 LB: > { %s25_s15 = sadd.s32 1, %s1518_s13  ;;  %p1230_p0 = scmp.ge.s32.totalorder %s1522_s14, 1  ;;  %s1522_s14 = sphi %s1553_s14, %s13_s14   ;;  %s1518_s13 = sphi %s1551_s13, %s1970_s13   ;;  %s1514_s12 = sphi %s1549_s12, %s1969_s12  }
   0x3   : > { %p27_p1 = scmp.ge.s32.totalorder %s25_s15, 2  ;;  %p168_p2 = scmp.lt.s32.totalorder %s1522_s14, 3 }
   0x5   : > { %s1972_s15 = smov (%p27_p1, %s25_s15), 0  ;;  %p169_p3 = pnand %p1230_p0, %p168_p2 }
   0x6   : > { %p202_p4 = scmp.lt.s32.totalorder (!%p169_p3), %s1514_s12, 1  ;;  %s1524_s30 = smov (!%p169_p3), 96  }
   0x7   : > { %172 = sbr.rel (%p169_p3) target bundleno = 405 (0x195), region = 32  ;;  %s1525_s4 = smov (!%p169_p3), 64  }
   0x8   : > { %s1526_s5 = smov (!%p169_p3), 32  }
   0xc   : > { %v1475_v0 = vld [vmem:[%s1966_s1 + $0x78] sm:$0xff]   ;;  %s1974_s12 = smov (!%p202_p4, %s1514_s12), 1  ;;  %vm485_vm0 = vcmask 1046528   ;;  %vm327_vm1 = vcmask 1044480   ;;  %v1477_v2 = vld [vmem:[%s1966_s1 + $0x70] sm:$0xff]   ;;  %vm435_vm2 = vcmask 1045504  }
   0xd   : > { %1341 = vmatprep.subr.bf16.mxu0 %v1475_v0  ;;  %v1476_v1 = vld [vmem:[%s1966_s1 + $0x38] sm:$0xff]   ;;  %s1418_s20 = smul.u32 220, %s1974_s12  ;;  %v1478_v3 = vld [vmem:[%s1966_s1 + $0x30] sm:$0xff]   ;;  %v1479_v4 = vld [vmem:[%s1966_s1 + $0x68] sm:$0xff]   ;;  %vm500_vm3 = vsmask.f32 5376 }
   0xe   : > { %1342 = vmatpush3.bf16.msra.mxu0 %v1476_v1  ;;  %vm352_vm4 = vsmask.f32 7424  ;;  %vm1528_vm5 = vmmov 0   ;;  %vm615_vm6 = vsmask.f32 6400  ;;  %vm669_vm7 = vcmask 261120  }
   0xf   : > { %s1585_s27 = scalar_lea.vmem %s1965_s0, %s1418_s20  ;;  %1343 = vmatprep.subr.bf16.mxu0 %v1477_v2  ;;  %vm680_vm8 = vcmask 523264   ;;  %vm691_vm9 = vcmask 785408  }
  0x10   : > { %v1449_v5 = vld [vmem:[%s1585_s27 + $0x3c] sm:$0xff]   ;;  %v225_v6 = vld [vmem:[%s1585_s27 + $0x8] sm:$0xf]  ;;  %v226_v7 = vld [vmem:[%s1585_s27 + $0xc] sm:$0xf] }
  0x11   : > { %v227_v8 = vld [vmem:[%s1585_s27 + $0x10] sm:$0xf]  ;;  %602 = vrot.lane.b32.xlu0 %v1449_v5, %s1524_s30  ;;  %v329_v9 = vrot.slane %v1449_v5, 3  ;;  %v268_v10 = vld [vmem:[%s1585_s27 + $0x4] sm:$0xe]  ;;  %v1599_v12 = vld [vmem:[%s1585_s27 + $0x74] sm:$0xff]   ;;  %v1608_v20 = vcombine.low %v225_v6, %v226_v7 }
  0x12   : > { %1344 = vmatpush3.bf16.msra.mxu0 %v1478_v3  ;;  %v1596_v11 = vcombine.low %v226_v7, %v227_v8  ;;  %v1601_v13 = vcombine.low %v268_v10, %v225_v6  ;;  %v1452_v14 = vld [vmem:[%s1585_s27 + $0x34] sm:$0xf8]   ;;  %v437_v16 = vrot.slane %v1599_v12, 2  ;;  %v1453_v19 = vld [vmem:[%s1585_s27 + $0x6c] sm:$0xfc]   ;;  %v1617_v27 = vld [vmem:[%s1585_s27 + $0x44] sm:$0xff]  }
  0x13   : > { %1345 = vmatprep.subr.bf16.mxu0 %v1479_v4  ;;  %v328_v18 = vrot.slane %v1452_v14, 3  ;;  %v228_v21 = vld [vmem:[%s1585_s27 + $0x14] sm:$0xf]  ;;  %v229_v22 = vld [vmem:[%s1585_s27 + $0x18] sm:$0xf]  ;;  %v436_v25 = vrot.slane %v1453_v19, 2 }
  0x14   : > { %v577_v15 = vrot.slane %v1596_v11, 1  ;;  %v576_v17 = vrot.slane %v1601_v13, 1  ;;  %v1614_v26 = vcombine.low %v228_v21, %v229_v22  ;;  %v502_v28 = vshrl.u32 %v1453_v19, 16  ;;  %v1629_v35 = vld [vmem:[%s1585_s27] sm:$0xff]   ;;  %v230_v4 = vld [vmem:[%s1585_s27 + $0x1c] sm:$0xf] }
  0x15   : > { %v330_v24 = vsel %vm327_vm1, %v328_v18, %v329_v9  ;;  %v505_v29 = vshll.u32 %v1453_v19, 16  ;;  %v510_v30 = vshrl.u32 %v1599_v12, 16  ;;  %v513_v31 = vshll.u32 %v1599_v12, 16  ;;  %v1641_v45 = vld [vmem:[%s1585_s27 + $0x7c] sm:$0xff]   ;;  %v1644_v46 = vld [vmem:[%s1585_s27 + $0x84] sm:$0xff]   ;;  %v1672_v10 = vld [vmem:[%s1585_s27 + $0x4c] sm:$0xff]  }
  0x16   : > { %v578_v23 = vsel %vm485_vm0, %v576_v17, %v577_v15  ;;  %339 = vrot.lane.b32.xlu0 %v330_v24, %s1526_s5  ;;  %v438_v32 = vsel %vm435_vm2, %v436_v25, %v437_v16  ;;  %v579_v33 = vrot.slane %v1614_v26, 1  ;;  %v331_v34 = vrot.slane %v1617_v27, 3  ;;  %v231_v5 = vld [vmem:[%s1585_s27 + $0x20] sm:$0xf]  ;;  %v232_v18 = vld [vmem:[%s1585_s27 + $0x24] sm:$0xf] }
  0x17   : > { %587 = vrot.lane.b32.xlu1 %v578_v23, %s1525_s4  ;;  %v361_v36 = vshll.u32 %v1608_v20, 16  ;;  %v504_v37 = vrot.slane %v502_v28, 2  ;;  %v507_v38 = vrot.slane %v505_v29, 3  ;;  %v512_v39 = vrot.slane %v510_v30, 2  ;;  %v1480_v19 = vld [vmem:[%s1966_s1 + $0x28] sm:$0xff]   ;;  %v1687_v24 = vld [vmem:[%s1585_s27 + $0x54] sm:$0xff]  }
  0x18   : > { %v515_v40 = vrot.slane %v513_v31, 3  ;;  %v580_v41 = vsel %vm485_vm0, %v577_v15, %v579_v33  ;;  %v332_v42 = vsel %vm327_vm1, %v329_v9, %v331_v34  ;;  %v354_v43 = vshrl.u32 %v1629_v35, 16  ;;  %1346 = vmatpush3.bf16.msra.mxu0 %v1480_v19  ;;  %v1481_v25 = vld [vmem:[%s1966_s1 + $0x60] sm:$0xff]   ;;  %v1469_v31 = vld [vmem:[%s1585_s27 + $0x94] ss:$0 sps:$4 sm:$0x77]  }
  0x19   : > { %v356_v44 = vshll.u32 %v1629_v35, 16  ;;  %v508_v47 = vor.u32 %v507_v38, %v504_v37  ;;  %v363_v49 = vrot.slane %v361_v36, 1  ;;  %v1648_v50 = vcombine.low %v227_v8, %v228_v21  ;;  %v1666_v8 = vld [vmem:[%s1585_s27 + $0x8c] sm:$0xff]   ;;  %v269_v21 = vld [vmem:[%s1585_s27 + $0x28] sm:$0xf]  ;;  %1347 = vmatprep.subr.bf16.mxu0 %v1481_v25  ;;  %v1492_v25 = vld [vmem:[%s1966_s1] sm:$0xff]  }
  0x1a   : > { %589 = vrot.lane.b32.xlu0 %v580_v41, %s1525_s4  ;;  %v516_v48 = vor.u32 %v515_v40, %v512_v39  ;;  %v519_v52 = vshrl.u32 %v1641_v45, 16  ;;  %v522_v53 = vshll.u32 %v1641_v45, 16  ;;  %v365_v54 = vshrl.u32 %v1608_v20, 16 }
  0x1b   : > { %447 = vrot.lane.b32.xlu1 %v438_v32, %s1524_s30  ;;  %v358_v51 = vrot.slane %v356_v44, 1  ;;  %v369_v56 = vshll.u32 %v1648_v50, 16  ;;  %v528_v57 = vshrl.u32 %v1644_v46, 16  ;;  %v531_v62 = vshll.u32 %v1644_v46, 16 }
  0x1c   : > { %v517_v55 = vsel %vm500_vm3, %v508_v47, %v516_v48  ;;  %v521_v59 = vrot.slane %v519_v52, 2  ;;  %v524_v60 = vrot.slane %v522_v53, 3  ;;  %v367_v61 = vor.u32 %v365_v54, %v363_v49  ;;  %v1484_v53 = vld [vmem:[%s1966_s1 + $0x18] sm:$0xff]  }
  0x1d   : > { %v359_v58 = vor.u32 %v358_v51, %v354_v43  ;;  %v371_v1 = vrot.slane %v369_v56, 1  ;;  %v530_v2 = vrot.slane %v528_v57, 2  ;;  %v533_v3 = vrot.slane %v531_v62, 3  ;;  %v1482_v51 = vld [vmem:[%s1966_s1 + $0x20] sm:$0xff]   ;;  %v1485_v56 = vld [vmem:[%s1966_s1 + $0x50] sm:$0xff]  }
  0x1e   : > { %554 = vrot.lane.b32.xlu0 %v517_v55, %s1526_s5  ;;  %v525_v0 = vor.u32 %v524_v60, %v521_v59  ;;  %v1663_v7 = vcombine.low %v229_v22, %v230_v4  ;;  %v439_v9 = vrot.slane %v1641_v45, 2  ;;  %v1677_v17 = vcombine.low %v230_v4, %v231_v5  ;;  %1348 = vmatpush3.bf16.msra.mxu0 %v1482_v51  ;;  %v1486_v60 = vld [vmem:[%s1966_s1 + $0x10] sm:$0xff]   ;;  %v1489_v4 = vld [vmem:[%s1585_s27 + $0xa4] sm:$0xfe]  }
  0x1f   : > { %341 = vrot.lane.b32.xlu1 %v332_v42, %s1526_s5  ;;  %v364_v63 = vsel %vm352_vm4, %v359_v58, %v363_v49  ;;  %v372_v14 = vsel %vm352_vm4, %v367_v61, %v371_v1  ;;  %v1675_v15 = vor.u32 %v533_v3, %v530_v2  ;;  %v537_v23 = vshrl.u32 %v1666_v8, 16  ;;  %v1488_v3 = vld [vmem:[%s1966_s1 + $0x8] sm:$0xff]  }
  0x20   : > { %v526_v6 = vsel %vm500_vm3, %v516_v48, %v525_v0  ;;  %v377_v22 = vshll.u32 %v1663_v7, 16  ;;  %v440_v28 = vsel %vm435_vm2, %v437_v16, %v439_v9  ;;  %v333_v29 = vrot.slane %v1672_v10, 3 }
  0x21   : > { %v540_v30 = vshll.u32 %v1666_v8, 16  ;;  %v535_v32 = vsel %vm500_vm3, %v525_v0, %v1675_v15  ;;  %v581_v36 = vrot.slane %v1677_v17, 1  ;;  %v373_v37 = vshrl.u32 %v1648_v50, 16 }
  0x22   : > { %556 = vrot.lane.b32.xlu0 %v526_v6, %s1526_s5  ;;  %v1707_v38 = vcombine.low %v232_v18, %v269_v21  ;;  %v441_v39 = vrot.slane %v1644_v46, 2  ;;  %v379_v12 = vrot.slane %v377_v22, 1  ;;  %v539_v40 = vrot.slane %v537_v23, 2 }
  0x23   : > { %397 = vrot.lane.b32.xlu1 %v364_v63, %s1525_s4  ;;  %v335_v16 = vrot.slane %v1687_v24, 3  ;;  %v1711_v41 = vcombine.low %v231_v5, %v232_v18  ;;  %v542_v42 = vrot.slane %v540_v30, 3  ;;  %v381_v43 = vshrl.u32 %v1663_v7, 16  ;;  %v1490_v5 = vld [vmem:[%s1585_s27 + $0xac] sm:$0xff]   ;;  %v1491_v18 = vld [vmem:[%s1966_s1 + $0x40] sm:$0xff]  }
  0x24   : > { %v334_v44 = vsel %vm327_vm1, %v331_v34, %v333_v29  ;;  %v582_v47 = vsel %vm485_vm0, %v579_v33, %v581_v36  ;;  %v375_v48 = vor.u32 %v373_v37, %v371_v1  ;;  %v583_v49 = vrot.slane %v1707_v38, 1  ;;  %v1487_v1 = vld [vmem:[%s1966_s1 + $0x48] sm:$0xff]   ;;  %v1470_v30 = vld [vmem:[%s1585_s27 + $0x5c] ss:$0 sps:$4 sm:$0x77]  }
  0x25   : > { %v546_v52 = vshrl.u32 %v1469_v31, 16  ;;  %v385_v34 = vshll.u32 %v1711_v41, 16  ;;  %v549_v33 = vshll.u32 %v1469_v31, 16  ;;  %v1740_v55 = vor.u32 %v542_v42, %v539_v40  ;;  %v1471_v31 = vld [vmem:[%s1585_s27 + $0x2c] ss:$0 sps:$4 sm:$0x11]  }
  0x26   : > { %604 = vrot.lane.b32.xlu0 %v1617_v27, %s1524_s30  ;;  %v1483_v27 = vld [vmem:[%s1966_s1 + $0x58] sm:$0xff]   ;;  %v380_v54 = vsel %vm352_vm4, %v375_v48, %v379_v12  ;;  %v1527_v57 = vmov 0.0   ;;  %v443_v58 = vrot.slane %v1666_v8, 2  ;;  %v617_v59 = vshrl.u32 %v1601_v13, 16 }
  0x27   : > { %399 = vrot.lane.b32.xlu1 %v372_v14, %s1525_s4  ;;  %1349 = vmatprep.subr.bf16.mxu0 %v1483_v27  ;;  %v620_v61 = vshll.u32 %v1601_v13, 16  ;;  %v1757_v62 = vrot.slane %v385_v34, 1  ;;  %v548_v63 = vrot.slane %v546_v52, 2  ;;  %v551_v0 = vrot.slane %v549_v33, 3  ;;  %v1497_v27 = vld [vmem:[%s1585_s27 + $0xc4] sm:$0xff]  }
  0x28   : > { %1394 = vmatprep.subr.bf16.mxu1 %v1527_v57  ;;  %1398 = vmatprep.mubr.msk.bf16.mxu1 %vm1528_vm5, %v1527_v57  ;;  %v442_v2 = vsel %vm435_vm2, %v439_v9, %v441_v39  ;;  %v544_v13 = vsel %vm500_vm3, %v1675_v15, %v1740_v55  ;;  %v619_v6 = vrot.slane %v617_v59, 1  ;;  %v625_v45 = vshrl.u32 %v1596_v11, 16  ;;  %v1498_v33 = vld [vmem:[%s1585_s27 + $0xcc] ss:$0 sps:$4 sm:$0x11]  }
  0x29   : > { %1350 = vmatpush3.bf16.msra.mxu0 %v1484_v53  ;;  %v622_v14 = vrot.slane %v620_v61, 2  ;;  %v486_v9 = vrot.slane %v1489_v4, 1  ;;  %v487_v15 = vrot.slane %v1490_v5, 1  ;;  %v628_v19 = vshll.u32 %v1596_v11, 16 }
  0x2a   : > { %558 = vrot.lane.b32.xlu0 %v535_v32, %s1526_s5  ;;  %1351 = vmatprep.subr.bf16.mxu0 %v1485_v56  ;;  %v336_v21 = vsel %vm327_vm1, %v333_v29, %v335_v16  ;;  %v584_v22 = vsel %vm485_vm0, %v581_v36, %v583_v49  ;;  %v383_v23 = vor.u32 %v381_v43, %v379_v12  ;;  %v627_v11 = vrot.slane %v625_v45, 1  ;;  %v1494_v29 = vld [vmem:[%s1966_s1 + $0x88] sm:$0xff]   ;;  %v1495_v12 = vld [vmem:[%s1966_s1 + $0x80] sm:$0xff]  }
  0x2b   : > { %449 = vrot.lane.b32.xlu1 %v440_v28, %s1524_s30  ;;  %v1493_v28 = vld [vmem:[%s1585_s27 + $0xb4] sm:$0xff]   ;;  %v630_v32 = vrot.slane %v628_v19, 2  ;;  %v1472_v36 = vld [vmem:[%s1585_s27 + $0x28] ss:$0 sps:$4 sm:$0x11]   ;;  %v552_v42 = vor.u32 %v551_v0, %v548_v63  ;;  %1395 = vmatpush3.bf16.msra.mxu1 %v1494_v29  ;;  %v634_v51 = vshrl.u32 %v1614_v26, 16  ;;  %v444_v34 = vsel %vm435_vm2, %v441_v39, %v443_v58 }
  0x2c   : > { %v489_v37 = vrot.slane %v1493_v28, 1  ;;  %v388_v40 = vsel %vm352_vm4, %v383_v23, %v1757_v62  ;;  %1396 = vmatprep.subr.bf16.mxu1 %v1527_v57  ;;  %v637_v52 = vshll.u32 %v1614_v26, 16  ;;  %v585_v56 = vrot.slane %v1471_v31, 1 }
  0x2d   : > { %1352 = vmatpush3.bf16.msra.mxu0 %v1486_v60  ;;  %v631_v48 = vor.u32 %v630_v32, %v627_v11  ;;  %v389_v26 = vshrl.u32 %v1711_v41, 16  ;;  %v493_v59 = vrot.slane %v1497_v27, 1  ;;  %v553_v60 = vsel %vm500_vm3, %v1740_v55, %v552_v42  ;;  %v1499_v11 = vld [vmem:[%s1585_s27 + $0x2c] ss:$0 sps:$4 sm:$0x33]  }
  0x2e   : > { %591 = vrot.lane.b32.xlu0 %v582_v47, %s1525_s4  ;;  %1353 = vmatprep.subr.bf16.mxu0 %v1487_v1  ;;  %v1813_v43 = vsel %vm485_vm0, %v487_v15, %v489_v37  ;;  %v623_v47 = vor.u32 %v622_v14, %v619_v6  ;;  %v393_v46 = vshll.u32 %v1472_v36, 16  ;;  %v495_v61 = vrot.slane %v1498_v33, 1  ;;  %v1474_v6 = vld [vmem:[%s1585_s27 + $0x94] ss:$0 sps:$4 sm:$0x33]  }
  0x2f   : > { %343 = vrot.lane.b32.xlu1 %v334_v44, %s1526_s5  ;;  %v1496_v44 = vld [vmem:[%s1585_s27 + $0xbc] sm:$0xff]   ;;  %1397 = vmatpush3.bf16.msra.mxu1 %v1495_v12  ;;  %v636_v0 = vrot.slane %v634_v51, 1  ;;  %v639_v1 = vrot.slane %v637_v52, 2  ;;  %v391_v4 = vor.u32 %v389_v26, %v1757_v62  ;;  %v643_v45 = vshrl.u32 %v1677_v17, 16 }
  0x30   : > { %v491_v53 = vrot.slane %v1496_v44, 1  ;;  %v632_v63 = vsel %vm615_vm6, %v623_v47, %v631_v48  ;;  %v395_v5 = vrot.slane %v393_v46, 1  ;;  %v445_v62 = vrot.slane %v1474_v6, 2 }
  0x31   : > { %1354 = vmatpush3.bf16.msra.mxu0 %v1488_v3  ;;  %v586_v3 = vsel %vm485_vm0, %v583_v49, %v585_v56  ;;  %v640_v14 = vor.u32 %v639_v1, %v636_v0 }
  0x32   : > { %606 = vrot.lane.b32.xlu0 %v1672_v10, %s1524_s30  ;;  %v1799_v10 = vsel %vm485_vm0, %v486_v9, %v487_v15  ;;  %1355 = vmatprep.subr.bf16.mxu0 %v1491_v18  ;;  %v1833_v39 = vsel %vm485_vm0, %v489_v37, %v491_v53  ;;  %v396_v49 = vsel %vm352_vm4, %v391_v4, %v395_v5  ;;  %v645_v15 = vrot.slane %v643_v45, 1 }
  0x33   : > { %401 = vrot.lane.b32.xlu1 %v380_v54, %s1525_s4  ;;  %v337_v54 = vrot.slane %v1470_v30, 3  ;;  %1399 = vmatmul.mubr.msk.bf16.vlgmr.msra.gmra.mxu1 %vm669_vm7, %v632_v63  ;;  %v641_v9 = vsel %vm615_vm6, %v631_v48, %v640_v14  ;;  %v664_v30 = vshll.u32 %v1499_v11, 16 }
  0x34   : > { %1402 = vmatprep.mubr.msk.bf16.mxu1 %vm1528_vm5, %v1527_v57 }
  0x35   : > { %1356 = vmatpush3.bf16.msra.mxu0 %v1492_v25  ;;  %v338_v55 = vsel %vm327_vm1, %v335_v16, %v337_v54  ;;  %v1473_v16 = vld [vmem:[%s1585_s27 + $0x5c] sm:$0xff]   ;;  %v666_v32 = vrot.slane %v664_v30, 2 }
  0x36   : > { %560 = vrot.lane.b32.xlu0 %v544_v13, %s1526_s5  ;;  %v1840_v13 = vsel %vm485_vm0, %v493_v59, %v495_v61 }
  0x37   : > { %451 = vrot.lane.b32.xlu1 %v442_v2, %s1524_s30  ;;  %v1837_v2 = vsel %vm485_vm0, %v491_v53, %v493_v59 }
  0x3a   : > { %593 = vrot.lane.b32.xlu0 %v584_v22, %s1525_s4  ;;  %v655_v22 = vshll.u32 %v1707_v38, 16 }
  0x3b   : > { %345 = vrot.lane.b32.xlu1 %v336_v21, %s1526_s5  ;;  %1403 = vmatmul.mubr.msk.bf16.gmra.mxu1 %vm669_vm7, %v641_v9  ;;  %v652_v21 = vshrl.u32 %v1707_v38, 16 }
  0x3c   : > { %1406 = vmatprep.mubr.msk.bf16.mxu1 %vm1528_vm5, %v1527_v57  ;;  %v657_v28 = vrot.slane %v655_v22, 2 }
  0x3d   : > { %v654_v25 = vrot.slane %v652_v21, 1 }
  0x3e   : > { %608 = vrot.lane.b32.xlu0 %v1687_v24, %s1524_s30  ;;  %v646_v24 = vshll.u32 %v1677_v17, 16  ;;  %v446_v17 = vsel %vm435_vm2, %v443_v58, %v445_v62  ;;  %v661_v58 = vshrl.u32 %v1499_v11, 16 }
  0x3f   : > { %403 = vrot.lane.b32.xlu1 %v388_v40, %s1525_s4  ;;  %v658_v8 = vor.u32 %v657_v28, %v654_v25 }
  0x40   : > { %v648_v18 = vrot.slane %v646_v24, 2  ;;  %v663_v29 = vrot.slane %v661_v58, 1 }
  0x42   : > { %562 = vrot.lane.b32.xlu0 %v553_v60, %s1526_s5  ;;  %v649_v19 = vor.u32 %v648_v18, %v645_v15  ;;  %v667_v38 = vor.u32 %v666_v32, %v663_v29 }
  0x43   : > { %453 = vrot.lane.b32.xlu1 %v444_v34, %s1524_s30 }
  0x44   : > { %v650_v23 = vsel %vm615_vm6, %v640_v14, %v649_v19  ;;  %v659_v31 = vsel %vm615_vm6, %v649_v19, %v658_v8  ;;  %v668_v36 = vsel %vm615_vm6, %v658_v8, %v667_v38 }
  0x45   : > { %1407 = vmatmul.mubr.msk.bf16.gmra.mxu1 %vm669_vm7, %v650_v23 }
  0x46   : > { %595 = vrot.lane.b32.xlu0 %v586_v3, %s1525_s4  ;;  %1410 = vmatprep.mubr.msk.bf16.mxu1 %vm1528_vm5, %v1527_v57 }
  0x47   : > { %347 = vrot.lane.b32.xlu1 %v338_v55, %s1526_s5 }
  0x4a   : > { %610 = vrot.lane.b32.xlu0 %v1473_v16, %s1524_s30 }
  0x4b   : > { %405 = vrot.lane.b32.xlu1 %v396_v49, %s1525_s4  ;;  %s1419_s4 = smul.u32 40, %s1974_s12 }
  0x4d   : > { %1411 = vmatmul.mubr.msk.bf16.gmra.mxu1 %vm669_vm7, %v659_v31  ;;  %s1940_s18 = scalar_lea.vmem %s1968_s3, %s1419_s4 }
  0x4e   : > { %1414 = vmatprep.mubr.msk.bf16.mxu1 %vm1528_vm5, %v1527_v57 }
  0x4f   : > { %455 = vrot.lane.b32.xlu1 %v446_v17, %s1524_s30 }
  0x55   : > { %1415 = vmatmul.mubr.msk.bf16.gmra.mxu1 %vm669_vm7, %v668_v36 }
  0x83   : > { %v603_v37 = vpop.permute.xlu0 %602 }
  0x88   : > { %v340_v40 = vpop.permute.xlu0 %339 }
  0x89   : > { %v588_v12 = vpop.permute.xlu1 %587  ;;  %v671_v27 = vsel %vm669_vm7, %v1629_v35, %v340_v40 }
  0x8c   : > { %v590_v44 = vpop.permute.xlu0 %589 }
  0x8d   : > { %v448_v42 = vpop.permute.xlu1 %447 }
  0x90   : > { %v555_v48 = vpop.permute.xlu0 %554 }
  0x91   : > { %v342_v47 = vpop.permute.xlu1 %341  ;;  %v709_v51 = vsel %vm669_vm7, %v1799_v10, %v555_v48 }
  0x92   : > { %v723_v52 = vsel %vm680_vm8, %v709_v51, %v588_v12  ;;  %v673_v35 = vsel %vm669_vm7, %v1608_v20, %v342_v47 }
  0x93   : > { %v733_v57 = vsel %vm691_vm9, %v723_v52, %v603_v37 }
  0x94   : > { %v557_v53 = vpop.permute.xlu0 %556  ;;  %945 = vmatprep.mubr.bf16.mxu0 %v733_v57 }
  0x95   : > { %v398_v34 = vpop.permute.xlu1 %397  ;;  %v712_v54 = vsel %vm669_vm7, %v1813_v43, %v557_v53 }
  0x96   : > { %v682_v33 = vsel %vm680_vm8, %v671_v27, %v398_v34  ;;  %v725_v59 = vsel %vm680_vm8, %v712_v54, %v590_v44 }
  0x97   : > { %v693_v56 = vsel %vm691_vm9, %v682_v33, %v448_v42 }
  0x98   : > { %946 = vmatmul.mubr.bf16.vlgmr.msra.gmra.mxu0 %v693_v56  ;;  %v605_v10 = vpop.permute.xlu0 %604 }
  0x99   : > { %v400_v26 = vpop.permute.xlu1 %399  ;;  %v736_v60 = vsel %vm691_vm9, %v725_v59, %v605_v10  ;;  %v1931_v59 = vld [vmem:[%s1967_s2] ss:$0 sm:$0xff] }
  0x9a   : > { %953 = vmatprep.mubr.bf16.mxu0 %v736_v60  ;;  %v684_v46 = vsel %vm680_vm8, %v673_v35, %v400_v26 }
  0x9c   : > { %v559_v63 = vpop.permute.xlu0 %558 }
  0x9d   : > { %v450_v61 = vpop.permute.xlu1 %449  ;;  %v715_v55 = vsel %vm669_vm7, %v1833_v39, %v559_v63 }
  0x9e   : > { %v696_v0 = vsel %vm691_vm9, %v684_v46, %v450_v61 }
  0xa0   : > { %954 = vmatmul.mubr.bf16.gmra.mxu0 %v696_v0  ;;  %v592_v1 = vpop.permute.xlu0 %591 }
  0xa1   : > { %v344_v43 = vpop.permute.xlu1 %343  ;;  %v727_v3 = vsel %vm680_vm8, %v715_v55, %v592_v1 }
  0xa2   : > { %v675_v20 = vsel %vm669_vm7, %v1648_v50, %v344_v43 }
  0xa4   : > { %v607_v5 = vpop.permute.xlu0 %606 }
  0xa5   : > { %v402_v4 = vpop.permute.xlu1 %401  ;;  %v739_v6 = vsel %vm691_vm9, %v727_v3, %v607_v5 }
  0xa6   : > { %961 = vmatprep.mubr.bf16.mxu0 %v739_v6  ;;  %v686_v14 = vsel %vm680_vm8, %v675_v20, %v402_v4 }
  0xa8   : > { %v561_v24 = vpop.permute.xlu0 %560 }
  0xa9   : > { %v452_v45 = vpop.permute.xlu1 %451  ;;  %v718_v39 = vsel %vm669_vm7, %v1837_v2, %v561_v24 }
  0xaa   : > { %v699_v16 = vsel %vm691_vm9, %v686_v14, %v452_v45 }
  0xab   : > { %962 = vmatmul.mubr.bf16.gmra.mxu0 %v699_v16 }
  0xac   : > { %v594_v62 = vpop.permute.xlu0 %593 }
  0xad   : > { %v346_v49 = vpop.permute.xlu1 %345  ;;  %v729_v9 = vsel %vm680_vm8, %v718_v39, %v594_v62 }
  0xae   : > { %v677_v50 = vsel %vm669_vm7, %v1663_v7, %v346_v49 }
  0xb0   : > { %v609_v18 = vpop.permute.xlu0 %608 }
  0xb1   : > { %v404_v15 = vpop.permute.xlu1 %403  ;;  %v742_v17 = vsel %vm691_vm9, %v729_v9, %v609_v18 }
  0xb2   : > { %969 = vmatprep.mubr.bf16.mxu0 %v742_v17  ;;  %v688_v19 = vsel %vm680_vm8, %v677_v50, %v404_v15 }
  0xb4   : > { %v563_v22 = vpop.permute.xlu0 %562 }
  0xb5   : > { %v454_v21 = vpop.permute.xlu1 %453  ;;  %v721_v2 = vsel %vm669_vm7, %v1840_v13, %v563_v22 }
  0xb6   : > { %v702_v23 = vsel %vm691_vm9, %v688_v19, %v454_v21 }
  0xb7   : > { %970 = vmatmul.mubr.bf16.gmra.mxu0 %v702_v23 }
  0xb8   : > { %v596_v28 = vpop.permute.xlu0 %595 }
  0xb9   : > { %v348_v25 = vpop.permute.xlu1 %347  ;;  %v731_v11 = vsel %vm680_vm8, %v721_v2, %v596_v28 }
  0xba   : > { %v679_v7 = vsel %vm669_vm7, %v1711_v41, %v348_v25 }
  0xbc   : > { %v611_v58 = vpop.permute.xlu0 %610 }
  0xbd   : > { %v406_v8 = vpop.permute.xlu1 %405  ;;  %v745_v30 = vsel %vm691_vm9, %v731_v11, %v611_v58 }
  0xbe   : > { %977 = vmatprep.mubr.bf16.mxu0 %v745_v30  ;;  %v690_v31 = vsel %vm680_vm8, %v679_v7, %v406_v8 }
  0xc1   : > { %v456_v29 = vpop.permute.xlu1 %455 }
  0xc2   : > { %v705_v32 = vsel %vm691_vm9, %v690_v31, %v456_v29 }
  0xc3   : > { %978 = vmatmul.mubr.bf16.gmra.mxu0 %v705_v32 }
  0xf3   : > { %v1020_v38 = vpop.f32.mrf.mxu1 }
  0xf5   : > { %v1400_v36 = vpop.f32.mrf.mxu1 }
  0xf7   : > { %v1023_v37 = vpop.f32.mrf.mxu1 }
  0xf9   : > { %v1401_v13 = vpop.f32.mrf.mxu1 }
  0xfb   : > { %v1028_v12 = vpop.f32.mrf.mxu1 }
  0xfd   : > { %v1404_v40 = vpop.f32.mrf.mxu1 }
  0xff   : > { %v1031_v42 = vpop.f32.mrf.mxu1 }
 0x101   : > { %v1405_v44 = vpop.f32.mrf.mxu1 }
 0x105   : > { %v1036_v47 = vpop.f32.mrf.mxu1 }
 0x107   : > { %v1408_v48 = vpop.f32.mrf.mxu1 }
 0x109   : > { %v1039_v51 = vpop.f32.mrf.mxu1 }
 0x10b   : > { %v1409_v52 = vpop.f32.mrf.mxu1 }
 0x10d   : > { %v1044_v57 = vpop.f32.mrf.mxu1 }
 0x10f   : > { %v1412_v41 = vpop.f32.mrf.mxu1 }
 0x111   : > { %v1047_v27 = vpop.f32.mrf.mxu1 }
 0x113   : > { %v1413_v34 = vpop.f32.mrf.mxu1 }
 0x115   : > { %v1924_v53 = vpop.f32.mrf.mxu1 }
 0x117   : > { %v1416_v33 = vpop.f32.mrf.mxu1 }
 0x119   : > { %v1926_v54 = vpop.f32.mrf.mxu1 }
 0x11b   : > { %v1417_v56 = vpop.f32.mrf.mxu1 }
 0x158   : > { %v1357_v26 = vpop.f32.mrf.mxu0 }
 0x15a   : > { %v1358_v10 = vpop.f32.mrf.mxu0 }
 0x15b   : > { %v1359_v60 = vadd.f32 %v1358_v10, %v1357_v26 }
 0x15c   : > { %v1360_v35 = vpop.f32.mrf.mxu0 }
 0x15d   : > { %v948_v46 = vadd.f32 %v1359_v60, %v1931_v59 }
 0x15e   : > { %v1361_v61 = vpop.f32.mrf.mxu0 }
 0x15f   : > { %v1362_v63 = vadd.f32 %v1361_v61, %v1360_v35  ;;  %v1021_v43 = vadd.f32 %v1020_v38, %v948_v46 }
 0x160   : > { %v1363_v0 = vpop.f32.mrf.mxu0 }
 0x161   : > { %v951_v1 = vadd.f32 %v1362_v63, %v1931_v59  ;;  %v1059_v6 = vmax.f32 %v1021_v43, 0.0 }
 0x162   : > { %v1364_v55 = vpop.f32.mrf.mxu0 }
 0x163   : > { %v1365_v3 = vadd.f32 %v1364_v55, %v1363_v0  ;;  %v1024_v4 = vadd.f32 %v1023_v37, %v951_v1 }
 0x164   : > { %v1366_v5 = vpop.f32.mrf.mxu0 }
 0x165   : > { %v1060_v20 = vmax.f32 %v1024_v4, 0.0  ;;  %v956_v14 = vadd.f32 %v1365_v3, %v1931_v59 }
 0x166   : > { %v1367_v45 = vpop.f32.mrf.mxu0 }
 0x167   : > { %v1315_v24 = vpack.c.bf16 %v1060_v20, %v1059_v6  ;;  %v1368_v16 = vadd.f32 %v1367_v45, %v1366_v5  ;;  %v1029_v49 = vadd.f32 %v1028_v12, %v956_v14 }
 0x169   : > { %1316 = vst [vmem:[%s1940_s18] sm:$0xff] %v1315_v24   ;;  %v959_v62 = vadd.f32 %v1368_v16, %v1931_v59  ;;  %v1061_v15 = vmax.f32 %v1029_v49, 0.0 }
 0x16b   : > { %v1032_v39 = vadd.f32 %v1031_v42, %v959_v62  ;;  %v1369_v9 = vpop.f32.mrf.mxu0 }
 0x16d   : > { %v1062_v18 = vmax.f32 %v1032_v39, 0.0  ;;  %v1370_v17 = vpop.f32.mrf.mxu0 }
 0x16e   : > { %v1371_v50 = vadd.f32 %v1370_v17, %v1369_v9 }
 0x16f   : > { %v1320_v19 = vpack.c.bf16 %v1062_v18, %v1061_v15  ;;  %v1372_v21 = vpop.f32.mrf.mxu0 }
 0x170   : > { %v964_v22 = vadd.f32 %v1371_v50, %v1931_v59 }
 0x171   : > { %1337 = vst [vmem:[%s1940_s18 + $0x8] sm:$0xff] %v1320_v19   ;;  %v1373_v23 = vpop.f32.mrf.mxu0 }
 0x172   : > { %v1374_v25 = vadd.f32 %v1373_v23, %v1372_v21  ;;  %v1037_v28 = vadd.f32 %v1036_v47, %v964_v22 }
 0x174   : > { %v967_v2 = vadd.f32 %v1374_v25, %v1931_v59  ;;  %v1063_v58 = vmax.f32 %v1037_v28, 0.0 }
 0x176   : > { %v1040_v11 = vadd.f32 %v1039_v51, %v967_v2 }
 0x177   : > { %v1375_v8 = vpop.f32.mrf.mxu0 }
 0x178   : > { %v1064_v30 = vmax.f32 %v1040_v11, 0.0 }
 0x179   : > { %v1376_v7 = vpop.f32.mrf.mxu0 }
 0x17a   : > { %v1325_v31 = vpack.c.bf16 %v1064_v30, %v1063_v58  ;;  %v1377_v29 = vadd.f32 %v1376_v7, %v1375_v8 }
 0x17b   : > { %v1378_v32 = vpop.f32.mrf.mxu0 }
 0x17c   : > { %1338 = vst [vmem:[%s1940_s18 + $0x10] sm:$0xff] %v1325_v31   ;;  %v972_v38 = vadd.f32 %v1377_v29, %v1931_v59 }
 0x17d   : > { %v1379_v36 = vpop.f32.mrf.mxu0 }
 0x17e   : > { %v1380_v37 = vadd.f32 %v1379_v36, %v1378_v32  ;;  %v1045_v13 = vadd.f32 %v1044_v57, %v972_v38 }
 0x180   : > { %v975_v12 = vadd.f32 %v1380_v37, %v1931_v59  ;;  %v1065_v44 = vmax.f32 %v1045_v13, 0.0 }
 0x182   : > { %v1048_v40 = vadd.f32 %v1047_v27, %v975_v12 }
 0x183   : > { %v1381_v42 = vpop.f32.mrf.mxu0 }
 0x184   : > { %v1066_v47 = vmax.f32 %v1048_v40, 0.0 }
 0x185   : > { %v1382_v48 = vpop.f32.mrf.mxu0 }
 0x186   : > { %v1330_v51 = vpack.c.bf16 %v1066_v47, %v1065_v44  ;;  %v1383_v52 = vadd.f32 %v1382_v48, %v1381_v42 }
 0x187   : > { %v1384_v41 = vpop.f32.mrf.mxu0 }
 0x188   : > { %1339 = vst [vmem:[%s1940_s18 + $0x18] sm:$0xff] %v1330_v51   ;;  %v980_v34 = vadd.f32 %v1383_v52, %v1931_v59 }
 0x189   : > { %v1385_v33 = vpop.f32.mrf.mxu0 }
 0x18a   : > { %v1386_v56 = vadd.f32 %v1385_v33, %v1384_v41  ;;  %v1053_v26 = vadd.f32 %v1924_v53, %v980_v34 }
 0x18c   : > { %v983_v57 = vadd.f32 %v1386_v56, %v1931_v59  ;;  %v1067_v27 = vmax.f32 %v1053_v26, 0.0 }
 0x18e   : > { %v1056_v10 = vadd.f32 %v1926_v54, %v983_v57 }
 0x190   : > { %v1068_v60 = vmax.f32 %v1056_v10, 0.0 }
 0x192   : > { %v1335_v35 = vpack.c.bf16 %v1068_v60, %v1067_v27 }
 0x194   : > { %1340 = vst [vmem:[%s1940_s18 + $0x20] sm:$0xff] %v1335_v35  }
 0x195 PF: > { %s13_s14 = sadd.s32 1, %s1522_s14   ;;  %s1969_s12 = smov %s1518_s13 }
 0x196   : > { %p10_p5 = scmp.ge.s32.totalorder %s13_s14, 4   ;;  %s1970_s13 = smov %s1972_s15 }
 0x198   :  { %12 = sbr.rel (!%p10_p5) target bundleno = 2 (0x2), region = 68 }

// kernel: two_blocks.2
= control target key start
LH: loop header
LB: loop body
LE: loop exit
PB: predicated region body
PF: predicated region fallthrough
CT: control target
= control target key end

     0   :  { %s2473_s12 = smov 0   ;;  %s2475_s13 = smov 0   ;;  %s3772_s0 = inlined_call_operand.vmem [shape: bf16[2,342,4], index: 0, kind: input, shape index: {}]   ;;  %s3773_s1 = inlined_call_operand.vmem [shape: bf16[48,128], index: 1, kind: input, shape index: {}]   ;;  %s3774_s2 = inlined_call_operand.vmem [shape: f32[1,128], index: 2, kind: input, shape index: {}]   ;;  %s3775_s3 = inlined_call_operand.vmem [shape: bf16[2,288,128], index: 3, kind: output, shape index: {}]  }
   0x1   :  { %s2477_s14 = smov 0  }
   0x2 LB: > { %s25_s15 = sadd.s32 1, %s2439_s13  ;;  %p2036_p0 = scmp.ge.s32.totalorder %s2443_s14, 1  ;;  %s2443_s14 = sphi %s2477_s14, %s13_s14   ;;  %s2439_s13 = sphi %s2475_s13, %s3844_s13   ;;  %s2435_s12 = sphi %s2473_s12, %s3843_s12  }
   0x3   : > { %p27_p1 = scmp.ge.s32.totalorder %s25_s15, 2  ;;  %p168_p2 = scmp.lt.s32.totalorder %s2443_s14, 3 }
   0x5   : > { %s3846_s15 = smov (%p27_p1, %s25_s15), 0  ;;  %p169_p3 = pnand %p2036_p0, %p168_p2 }
   0x7   : > { %172 = sbr.rel (%p169_p3) target bundleno = 633 (0x279), region = 32 }
   0xc   : > { %p202_p4 = scmp.lt.s32.totalorder %s2435_s12, 1  ;;  %vm554_vm0 = vcmask 1046528   ;;  %vm814_vm1 = vcmask 1045504   ;;  %vm366_vm2 = vsmask.f32 7424  ;;  %s2445_s20 = smov 12  }
   0xd   : > { %s2446_s21 = smov 8   ;;  %s2447_s22 = smov 20   ;;  %vm684_vm3 = vsmask.f32 6400  ;;  %vm944_vm4 = vsmask.f32 5376 }
   0xe   : > { %s3848_s12 = smov (!%p202_p4, %s2435_s12), 1  ;;  %s2448_s23 = smov 4   ;;  %vm1074_vm5 = vcmask 1044480   ;;  %vm1148_vm6 = vcmask 31744   ;;  %vm1185_vm7 = vcmask 64512   ;;  %vm1222_vm8 = vcmask 97280  }
   0xf   : > { %s2341_s16 = smul.u32 172, %s3848_s12  ;;  %s2449_s28 = smov 16   ;;  %vm1259_vm9 = vcmask 130048   ;;  %vm1296_vm10 = vcmask 162816   ;;  %vm1333_vm11 = vcmask 195584   ;;  %vm1370_vm12 = vcmask 228352  }
  0x10   : > { %s2450_s4 = smov 24   ;;  %s2451_s5 = smov 28   ;;  %vm1407_vm13 = vcmask 261120   ;;  %vm1444_vm14 = vcmask 293888   ;;  %vm1495_vm15 = vcmask 392192  }
  0x11   : > { %s2497_s19 = scalar_lea.vmem %s3772_s0, %s2341_s16  ;;  %s2452_s6 = smov 32  }
  0x12   : > { %v226_v0 = vld [vmem:[%s2497_s19 + $0xc] sm:$0xf]  ;;  %v227_v1 = vld [vmem:[%s2497_s19 + $0x10] sm:$0xf]  ;;  %v2502_v2 = vld [vmem:[%s2497_s19 + $0x14] sm:$0xf] }
  0x13   : > { %v261_v3 = vld [vmem:[%s2497_s19 + $0x8] sm:$0xe]  ;;  %v2506_v4 = vcombine.low %v227_v1, %v2502_v2  ;;  %v224_v5 = vld [vmem:[%s2497_s19 + $0x4] sm:$0xf]  ;;  %v260_v8 = vld [vmem:[%s2497_s19] sm:$0xe] }
  0x14   : > { %v225_v6 = vld [vmem:[%s2497_s19 + $0x8] sm:$0xf]  ;;  %v2059_v7 = vcombine.low %v261_v3, %v226_v0  ;;  %v223_v10 = vld [vmem:[%s2497_s19] sm:$0xf]  ;;  %v2058_v13 = vcombine.low %v260_v8, %v224_v5  ;;  %v2519_v16 = vld [vmem:[%s2497_s19 + $0x18] sm:$0xff]   ;;  %s2342_s9 = smul.u32 144, %s3848_s12 }
  0x15   : > { %v2511_v9 = vcombine.low %v225_v6, %v226_v0  ;;  %v266_v11 = vld [vmem:[%s2497_s19 + $0x8] sm:$0xc]  ;;  %v558_v12 = vrot.slane %v2506_v4, 1  ;;  %v2516_v14 = vcombine.low %v223_v10, %v224_v5  ;;  %v816_v19 = vrot.slane %v2506_v4, 2  ;;  %v267_v34 = vld [vmem:[%s2497_s19 + $0x10] sm:$0xc] }
  0x16   : > { %v2063_v15 = vcombine.low %v266_v11, %v226_v0  ;;  %v639_v17 = vrot.slane %v2059_v7, 1  ;;  %v555_v21 = vrot.slane %v2058_v13, 1  ;;  %v560_v28 = vrot.slane %v2519_v16, 1  ;;  %v2550_v45 = vld [vmem:[%s2497_s19 + $0x20] sm:$0xff]   ;;  %v2577_v63 = vld [vmem:[%s2497_s19 + $0x50] sm:$0xff]   ;;  %s3665_s16 = scalar_lea.vmem %s3775_s3, %s2342_s9 }
  0x17   : > { %v556_v18 = vrot.slane %v2511_v9, 1  ;;  %v375_v20 = vshll.u32 %v2511_v9, 16  ;;  %v368_v24 = vshrl.u32 %v2516_v14, 16  ;;  %v370_v25 = vshll.u32 %v2516_v14, 16  ;;  %v272_v5 = vld [vmem:[%s2497_s19 + $0x10] sm:$0x8] }
  0x18   : > { %v815_v22 = vrot.slane %v2063_v15, 2  ;;  %v640_v23 = vsel %vm554_vm0, %v639_v17, %v558_v12  ;;  %v379_v31 = vshrl.u32 %v2511_v9, 16  ;;  %v383_v32 = vshll.u32 %v2506_v4, 16  ;;  %v2394_v6 = vld [vmem:[%s3773_s1 + $0x10] sm:$0xff]   ;;  %v2397_v17 = vld [vmem:[%s3773_s1 + $0x8] sm:$0xff]  }
  0x19   : > { %645 = vrot.lane.b32.xlu0 %v640_v23, %s2445_s20  ;;  %v557_v26 = vsel %vm554_vm0, %v555_v21, %v556_v18  ;;  %v377_v29 = vrot.slane %v375_v20, 1  ;;  %v372_v30 = vrot.slane %v370_v25, 1  ;;  %v387_v33 = vshrl.u32 %v2506_v4, 16  ;;  %2293 = vmatprep.subr.bf16.mxu0 %v2394_v6  ;;  %v2604_v23 = vld [vmem:[%s2497_s19 + $0x58] sm:$0xff]  }
  0x1a   : > { %v817_v27 = vsel %vm814_vm1, %v815_v22, %v816_v19  ;;  %592 = vrot.lane.b32.xlu1 %v557_v26, %s2446_s21  ;;  %v559_v35 = vsel %vm554_vm0, %v556_v18, %v558_v12  ;;  %v2538_v36 = vshll.u32 %v2519_v16, 16  ;;  %v2541_v37 = vshrl.u32 %v2519_v16, 16  ;;  %2335 = vmatprep.subr.bf16.mxu1 %v2394_v6 }
  0x1b   : > { %v686_v38 = vshrl.u32 %v2059_v7, 16  ;;  %v373_v39 = vor.u32 %v372_v30, %v368_v24  ;;  %v818_v40 = vrot.slane %v2519_v16, 2  ;;  %v381_v41 = vor.u32 %v379_v31, %v377_v29  ;;  %2294 = vmatpush3.bf16.msra.mxu0 %v2394_v6  ;;  %2338 = vmatpush3.bf16.msra.mxu1 %v2394_v6 }
  0x1c   : > { %v2545_v42 = vrot.slane %v383_v32, 1  ;;  %v693_v43 = vrot.slane %v387_v33, 1  ;;  %v694_v44 = vrot.slane %v383_v32, 2  ;;  %v689_v48 = vshll.u32 %v2059_v7, 16  ;;  %2295 = vmatprep.subr.bf16.mxu0 %v2397_v17  ;;  %2336 = vmatprep.subr.bf16.mxu1 %v2397_v17 }
  0x1d   : > { %852 = vrot.lane.b32.xlu0 %v817_v27, %s2447_s22  ;;  %v378_v46 = vsel %vm366_vm2, %v373_v39, %v377_v29  ;;  %v688_v47 = vrot.slane %v686_v38, 1  ;;  %v2557_v49 = vsel %vm554_vm0, %v558_v12, %v560_v28  ;;  %v697_v50 = vrot.slane %v2541_v37, 1  ;;  %v2635_v39 = vld [vmem:[%s2497_s19 + $0x60] sm:$0xff]  }
  0x1e   : > { %594 = vrot.lane.b32.xlu1 %v559_v35, %s2446_s21  ;;  %v698_v51 = vrot.slane %v2538_v36, 2  ;;  %v2064_v52 = vcombine.low %v267_v34, %v2502_v2  ;;  %v691_v53 = vrot.slane %v689_v48, 2  ;;  %v386_v54 = vsel %vm366_vm2, %v381_v41, %v2545_v42  ;;  %3805 = vst [vmem:[#allocation3_spill] sm:$0xff] %v2635_v39 }
  0x1f   : > { %v695_v55 = vor.u32 %v694_v44, %v693_v43  ;;  %v819_v59 = vsel %vm814_vm1, %v816_v19, %v818_v40  ;;  %v2571_v61 = vshll.u32 %v2550_v45, 16  ;;  %v2574_v62 = vshrl.u32 %v2550_v45, 16  ;;  %v2398_v19 = vld [vmem:[%s3773_s1] sm:$0xff]   ;;  %2296 = vmatpush3.bf16.msra.mxu0 %v2397_v17  ;;  %2339 = vmatpush3.bf16.msra.mxu1 %v2397_v17 }
  0x20   : > { %v692_v56 = vor.u32 %v691_v53, %v688_v47  ;;  %v946_v57 = vshrl.u32 %v2064_v52, 16  ;;  %v949_v58 = vshll.u32 %v2064_v52, 16  ;;  %v2568_v60 = vor.u32 %v698_v51, %v697_v50  ;;  %2297 = vmatprep.subr.bf16.mxu0 %v2398_v19  ;;  %2337 = vmatprep.subr.bf16.mxu1 %v2398_v19 }
  0x21   : > { %515 = vrot.lane.b32.xlu0 %v378_v46, %s2448_s23  ;;  %v899_v0 = vrot.slane %v2064_v52, 2  ;;  %v953_v1 = vrot.slane %v2541_v37, 2  ;;  %v954_v3 = vrot.slane %v2538_v36, 3  ;;  %v820_v12 = vrot.slane %v2550_v45, 2 }
  0x22   : > { %647 = vrot.lane.b32.xlu1 %v2557_v49, %s2445_s20  ;;  %v696_v7 = vsel %vm684_vm3, %v692_v56, %v695_v55  ;;  %v948_v8 = vrot.slane %v946_v57, 2  ;;  %v951_v10 = vrot.slane %v949_v58, 3  ;;  %v700_v11 = vsel %vm684_vm3, %v695_v55, %v2568_v60 }
  0x23   : > { %v957_v13 = vrot.slane %v2574_v62, 2  ;;  %v958_v15 = vrot.slane %v2571_v61, 3  ;;  %v900_v18 = vsel %vm814_vm1, %v899_v0, %v818_v40  ;;  %v955_v20 = vor.u32 %v954_v3, %v953_v1  ;;  %2298 = vmatpush3.bf16.msra.mxu0 %v2398_v19  ;;  %2340 = vmatpush3.bf16.msra.mxu1 %v2398_v19  ;;  %v2687_v0 = vld [vmem:[%s2497_s19 + $0x28] sm:$0xff]  }
  0x24   : > { %v952_v21 = vor.u32 %v951_v10, %v948_v8  ;;  %v2068_v22 = vcombine.low %v272_v5, %v2502_v2  ;;  %v2607_v24 = vshll.u32 %v2577_v63, 16  ;;  %v2612_v25 = vsel %vm814_vm1, %v818_v40, %v820_v12 }
  0x25   : > { %517 = vrot.lane.b32.xlu0 %v386_v54, %s2448_s23  ;;  %v2614_v26 = vor.u32 %v958_v15, %v957_v13  ;;  %v1076_v2 = vrot.slane %v2519_v16, 3  ;;  %v2619_v27 = vshrl.u32 %v2577_v63, 16  ;;  %v2626_v32 = vshll.u32 %v2604_v23, 16 }
  0x26   : > { %854 = vrot.lane.b32.xlu1 %v819_v59, %s2447_s22  ;;  %v956_v29 = vsel %vm944_vm4, %v952_v21, %v955_v20  ;;  %v1075_v30 = vrot.slane %v2068_v22, 3  ;;  %v3779_v31 = vrot.slane %v2607_v24, 1  ;;  %v389_v35 = vor.u32 %v387_v33, %v2545_v42  ;;  %v2684_v59 = vld [vmem:[%s2497_s19 + $0x68] sm:$0xff]  }
  0x27   : > { %3804 = vst [vmem:[#allocation2_spill] sm:$0xff] %v2626_v32  ;;  %v960_v34 = vsel %vm944_vm4, %v955_v20, %v2614_v26  ;;  %v393_v38 = vrot.slane %v2538_v36, 1  ;;  %v457_v33 = vrot.slane %v2626_v32, 1  ;;  %v1078_v42 = vrot.slane %v2550_v45, 3 }
  0x28   : > { %v1077_v40 = vsel %vm1074_vm5, %v1075_v30, %v1076_v2  ;;  %v453_v41 = vor.u32 %v2619_v27, %v3779_v31  ;;  %v2647_v43 = vshrl.u32 %v2604_v23, 16  ;;  %v2650_v44 = vshll.u32 %v2635_v39, 16 }
  0x29   : > { %775 = vrot.lane.b32.xlu0 %v696_v7, %s2449_s28  ;;  %v394_v36 = vsel %vm366_vm2, %v389_v35, %v393_v38  ;;  %v397_v47 = vor.u32 %v2541_v37, %v393_v38  ;;  %v401_v48 = vrot.slane %v2571_v61, 1  ;;  %v1079_v50 = vsel %vm1074_vm5, %v1076_v2, %v1078_v42 }
  0x2a   : > { %777 = vrot.lane.b32.xlu1 %v700_v11, %s2449_s28  ;;  %3806 = vst [vmem:[#allocation4_spill] sm:$0xff] %v2647_v43  ;;  %v458_v46 = vsel %vm366_vm2, %v453_v41, %v457_v33  ;;  %v461_v51 = vor.u32 %v2647_v43, %v457_v33  ;;  %v465_v52 = vrot.slane %v2650_v44, 1  ;;  %v3778_v54 = vrot.slane %v2577_v63, 1 }
  0x2b   : > { %v402_v37 = vsel %vm366_vm2, %v397_v47, %v401_v48  ;;  %v576_v55 = vrot.slane %v2604_v23, 1  ;;  %v562_v56 = vrot.slane %v2550_v45, 1  ;;  %v578_v58 = vrot.slane %v2635_v39, 1 }
  0x2c   : > { %v466_v53 = vsel %vm366_vm2, %v461_v51, %v465_v52  ;;  %v2696_v5 = vshrl.u32 %v2635_v39, 16  ;;  %v564_v6 = vrot.slane %v2687_v0, 1  ;;  %v729_v7 = vrot.slane %v2647_v43, 1 }
  0x2d   : > { %905 = vrot.lane.b32.xlu0 %v900_v18, %s2450_s4  ;;  %v2678_v57 = vsel %vm554_vm0, %v3778_v54, %v576_v55  ;;  %v563_v1 = vsel %vm554_vm0, %v560_v28, %v562_v56  ;;  %v579_v3 = vsel %vm554_vm0, %v576_v55, %v578_v58  ;;  %v730_v8 = vrot.slane %v2626_v32, 2  ;;  %v2773_v55 = vld [vmem:[%s2497_s19 + $0x30] sm:$0xff]  }
  0x2e   : > { %907 = vrot.lane.b32.xlu1 %v2612_v25, %s2450_s4  ;;  %3807 = vst [vmem:[#allocation5_spill] sm:$0xff] %v2678_v57  ;;  %v701_v16 = vrot.slane %v2574_v62, 1  ;;  %v702_v28 = vrot.slane %v2571_v61, 2  ;;  %v2707_v10 = vshll.u32 %v2687_v0, 16  ;;  %v2710_v11 = vshrl.u32 %v2687_v0, 16 }
  0x2f   : > { %v733_v13 = vrot.slane %v2696_v5, 1  ;;  %v734_v15 = vrot.slane %v2650_v44, 2  ;;  %v2715_v17 = vshll.u32 %v2684_v59, 16  ;;  %v2718_v18 = vshrl.u32 %v2684_v59, 16 }
  0x30   : > { %v2730_v20 = vsel %vm554_vm0, %v562_v56, %v564_v6  ;;  %v703_v21 = vor.u32 %v702_v28, %v701_v16  ;;  %v705_v22 = vrot.slane %v2710_v11, 1  ;;  %v706_v2 = vrot.slane %v2707_v10, 2 }
  0x31   : > { %1035 = vrot.lane.b32.xlu0 %v956_v29, %s2451_s5  ;;  %v2734_v29 = vor.u32 %v730_v8, %v729_v7  ;;  %v735_v30 = vor.u32 %v734_v15, %v733_v13  ;;  %v738_v35 = vrot.slane %v2715_v17, 2  ;;  %v836_v47 = vrot.slane %v2635_v39, 2 }
  0x32   : > { %1037 = vrot.lane.b32.xlu1 %v960_v34, %s2451_s5  ;;  %v737_v34 = vrot.slane %v2718_v18, 1  ;;  %v704_v38 = vsel %vm684_vm3, %v2568_v60, %v703_v21  ;;  %v3777_v60 = vrot.slane %v2604_v23, 2  ;;  %v990_v7 = vrot.slane %v2650_v44, 3 }
  0x33   : > { %3808 = vst [vmem:[#allocation6_spill] sm:$0xff] %v2734_v29  ;;  %v736_v41 = vsel %vm684_vm3, %v2734_v29, %v735_v30  ;;  %v961_v8 = vrot.slane %v2710_v11, 2  ;;  %v962_v16 = vrot.slane %v2707_v10, 3  ;;  %v2793_v28 = vshrl.u32 %v2773_v55, 16 }
  0x34   : > { %v2748_v33 = vor.u32 %v738_v35, %v737_v34  ;;  %v2764_v51 = vsel %vm814_vm1, %v3777_v60, %v836_v47  ;;  %v993_v13 = vrot.slane %v2718_v18, 2  ;;  %v994_v15 = vrot.slane %v2715_v17, 3 }
  0x35   : > { %1112 = vrot.lane.b32.xlu0 %v1077_v40, %s2452_s6  ;;  %v2744_v40 = vor.u32 %v706_v2, %v705_v22  ;;  %3809 = vst [vmem:[#allocation7_spill] sm:$0xff] %v2764_v51  ;;  %v963_v34 = vor.u32 %v962_v16, %v961_v8  ;;  %v965_v35 = vrot.slane %v2793_v28, 2  ;;  %v1096_v16 = vrot.slane %v2684_v59, 3 }
  0x36   : > { %519 = vrot.lane.b32.xlu1 %v394_v36, %s2448_s23  ;;  %v3785_v61 = vrot.slane %v2773_v55, 3 }
  0x37   : > { %v708_v36 = vsel %vm684_vm3, %v703_v21, %v2744_v40 }
  0x39   : > { %535 = vrot.lane.b32.xlu0 %v458_v46, %s2448_s23  ;;  %v740_v46 = vsel %vm684_vm3, %v735_v30, %v2748_v33 }
  0x3a   : > { %1114 = vrot.lane.b32.xlu1 %v1079_v50, %s2452_s6  ;;  %v822_v50 = vrot.slane %v2687_v0, 2 }
  0x3c   : > { %v823_v56 = vsel %vm814_vm1, %v820_v12, %v822_v50  ;;  %v2790_v12 = vshll.u32 %v2773_v55, 16 }
  0x3d   : > { %521 = vrot.lane.b32.xlu0 %v402_v37, %s2448_s23  ;;  %v838_v37 = vrot.slane %v2684_v59, 2 }
  0x3e   : > { %537 = vrot.lane.b32.xlu1 %v466_v53, %s2448_s23  ;;  %v2770_v53 = vld [vmem:[%s2497_s19 + $0x70] sm:$0xff]  }
  0x3f   : > { %v2798_v21 = vshll.u32 %v2770_v53, 16  ;;  %v2801_v22 = vshrl.u32 %v2770_v53, 16 }
  0x41   : > { %596 = vrot.lane.b32.xlu0 %v2557_v49, %s2446_s21  ;;  %v580_v49 = vrot.slane %v2684_v59, 1  ;;  %v741_v59 = vrot.slane %v2801_v22, 1 }
  0x42   : > { %612 = vrot.lane.b32.xlu1 %v2678_v57, %s2446_s21 }
  0x43   : > { %v2724_v19 = vsel %vm554_vm0, %v578_v58, %v580_v49  ;;  %v839_v58 = vsel %vm814_vm1, %v836_v47, %v838_v37  ;;  %v998_v47 = vrot.slane %v2798_v21, 3 }
  0x45   : > { %598 = vrot.lane.b32.xlu0 %v563_v1, %s2446_s21 }
  0x46   : > { %614 = vrot.lane.b32.xlu1 %v579_v3, %s2446_s21 }
  0x49   : > { %649 = vrot.lane.b32.xlu0 %v563_v1, %s2445_s20  ;;  %v840_v1 = vrot.slane %v2770_v53, 2 }
  0x4a   : > { %665 = vrot.lane.b32.xlu1 %v579_v3, %s2445_s20  ;;  %v824_v3 = vrot.slane %v2773_v55, 2 }
  0x4b   : > { %v2807_v2 = vsel %vm814_vm1, %v838_v37, %v840_v1 }
  0x4c   : > { %v2813_v30 = vsel %vm814_vm1, %v822_v50, %v824_v3  ;;  %v964_v50 = vsel %vm944_vm4, %v2614_v26, %v963_v34  ;;  %v3776_v26 = vrot.slane %v2635_v39, 3 }
  0x4d   : > { %651 = vrot.lane.b32.xlu0 %v2730_v20, %s2445_s20 }
  0x4e   : > { %667 = vrot.lane.b32.xlu1 %v2724_v19, %s2445_s20 }
  0x51   : > { %779 = vrot.lane.b32.xlu0 %v704_v38, %s2449_s28  ;;  %v966_v38 = vrot.slane %v2790_v12, 3 }
  0x52   : > { %795 = vrot.lane.b32.xlu1 %v736_v41, %s2449_s28 }
  0x53   : > { %v2827_v37 = vor.u32 %v966_v38, %v965_v35  ;;  %v1097_v35 = vsel %vm1074_vm5, %v3776_v26, %v1096_v16  ;;  %v469_v38 = vor.u32 %v2696_v5, %v465_v52  ;;  %v3784_v52 = vrot.slane %v2790_v12, 1 }
  0x55   : > { %781 = vrot.lane.b32.xlu0 %v708_v36, %s2449_s28  ;;  %v995_v36 = vor.u32 %v994_v15, %v993_v13  ;;  %v405_v15 = vor.u32 %v2574_v62, %v401_v48 }
  0x56   : > { %797 = vrot.lane.b32.xlu1 %v740_v46, %s2449_s28  ;;  %v997_v46 = vrot.slane %v2801_v22, 2 }
  0x59   : > { %856 = vrot.lane.b32.xlu0 %v2612_v25, %s2447_s22  ;;  %v989_v25 = vrot.slane %v2696_v5, 2 }
  0x5a   : > { %872 = vrot.lane.b32.xlu1 %v2764_v51, %s2447_s22 }
  0x5b   : > { %v2817_v41 = vor.u32 %v990_v7, %v989_v25  ;;  %v968_v25 = vsel %vm944_vm4, %v963_v34, %v2827_v37  ;;  %v1080_v7 = vrot.slane %v2687_v0, 3  ;;  %v409_v34 = vrot.slane %v2707_v10, 1 }
  0x5d   : > { %858 = vrot.lane.b32.xlu0 %v823_v56, %s2447_s22  ;;  %3810 = vst [vmem:[#allocation8_spill] sm:$0xff] %v2817_v41  ;;  %v1081_v13 = vsel %vm1074_vm5, %v1078_v42, %v1080_v7  ;;  %v410_v45 = vsel %vm366_vm2, %v405_v15, %v409_v34  ;;  %v3783_v42 = vrot.slane %v2770_v53, 3  ;;  %v1083_v44 = vsel %vm1074_vm5, %v1080_v7, %v3785_v61 }
  0x5e   : > { %874 = vrot.lane.b32.xlu1 %v839_v58, %s2447_s22  ;;  %v413_v48 = vor.u32 %v2710_v11, %v409_v34 }
  0x5f   : > { %v1099_v5 = vsel %vm1074_vm5, %v1096_v16, %v3783_v42  ;;  %v709_v16 = vrot.slane %v2793_v28, 1 }
  0x61   : > { %909 = vrot.lane.b32.xlu0 %v823_v56, %s2450_s4  ;;  %v996_v56 = vsel %vm944_vm4, %v2817_v41, %v995_v36 }
  0x62   : > { %925 = vrot.lane.b32.xlu1 %v839_v58, %s2450_s4  ;;  %v2831_v58 = vor.u32 %v998_v47, %v997_v46  ;;  %v418_v46 = vsel %vm366_vm2, %v413_v48, %v3784_v52  ;;  %v582_v47 = vrot.slane %v2770_v53, 1 }
  0x64   : > { %v1000_v8 = vsel %vm944_vm4, %v995_v36, %v2831_v58  ;;  %v473_v36 = vrot.slane %v2715_v17, 1  ;;  %v3782_v17 = vrot.slane %v2798_v21, 1  ;;  %v583_v7 = vsel %vm554_vm0, %v580_v49, %v582_v47 }
  0x65   : > { %911 = vrot.lane.b32.xlu0 %v2813_v30, %s2450_s4  ;;  %v742_v49 = vrot.slane %v2798_v21, 2 }
  0x66   : > { %927 = vrot.lane.b32.xlu1 %v2807_v2, %s2450_s4  ;;  %v474_v62 = vsel %vm366_vm2, %v469_v38, %v473_v36  ;;  %v477_v10 = vor.u32 %v2718_v18, %v473_v36  ;;  %v566_v18 = vrot.slane %v2773_v55, 1 }
  0x68   : > { %v482_v11 = vsel %vm366_vm2, %v477_v10, %v3782_v17 }
  0x69   : > { %1039 = vrot.lane.b32.xlu0 %v964_v50, %s2451_s5  ;;  %v2891_v50 = vld [vmem:[%s2497_s19 + $0x78] sm:$0xff]  }
  0x6a   : > { %1055 = vrot.lane.b32.xlu1 %v996_v56, %s2451_s5  ;;  %v2894_v56 = vld [vmem:[%s2497_s19 + $0x38] sm:$0xff]   ;;  %v2922_v15 = vshrl.u32 %v2891_v50, 16 }
  0x6b   : > { %v2911_v0 = vshll.u32 %v2894_v56, 16 }
  0x6c   : > { %v745_v48 = vrot.slane %v2922_v15, 1  ;;  %v1001_v54 = vrot.slane %v2922_v15, 2 }
  0x6d   : > { %1041 = vrot.lane.b32.xlu0 %v968_v25, %s2451_s5  ;;  %v567_v25 = vsel %vm554_vm0, %v564_v6, %v566_v18  ;;  %v2914_v6 = vshrl.u32 %v2894_v56, 16  ;;  %v714_v36 = vrot.slane %v2911_v0, 2 }
  0x6e   : > { %1057 = vrot.lane.b32.xlu1 %v1000_v8, %s2451_s5  ;;  %v3780_v8 = vrot.slane %v2891_v50, 1 }
  0x6f   : > { %v713_v38 = vrot.slane %v2914_v6, 1 }
  0x71   : > { %1116 = vrot.lane.b32.xlu0 %v1081_v13, %s2452_s6  ;;  %v2919_v13 = vshll.u32 %v2891_v50, 16 }
  0x72   : > { %1132 = vrot.lane.b32.xlu1 %v1097_v35, %s2452_s6 }
  0x73   : > { %v1002_v31 = vrot.slane %v2919_v13, 3 }
  0x75   : > { %523 = vrot.lane.b32.xlu0 %v410_v45, %s2448_s23 }
  0x76   : > { %539 = vrot.lane.b32.xlu1 %v474_v62, %s2448_s23  ;;  %v2936_v62 = vsel %vm554_vm0, %v582_v47, %v3780_v8 }
  0x79   : > { %1118 = vrot.lane.b32.xlu0 %v1083_v44, %s2452_s6  ;;  %v743_v44 = vor.u32 %v742_v49, %v741_v59 }
  0x7a   : > { %1134 = vrot.lane.b32.xlu1 %v1099_v5, %s2452_s6  ;;  %v746_v5 = vrot.slane %v2919_v13, 2 }
  0x7b   : > { %v744_v47 = vsel %vm684_vm3, %v2748_v33, %v743_v44  ;;  %v826_v33 = vrot.slane %v2894_v56, 2 }
  0x7d   : > { %525 = vrot.lane.b32.xlu0 %v418_v46, %s2448_s23 }
  0x7e   : > { %541 = vrot.lane.b32.xlu1 %v482_v11, %s2448_s23  ;;  %v2946_v11 = vor.u32 %v714_v36, %v713_v38  ;;  %v842_v38 = vrot.slane %v2891_v50, 2 }
  0x81   : > { %600 = vrot.lane.b32.xlu0 %v2730_v20, %s2446_s21  ;;  %v3781_v20 = vrot.slane %v2894_v56, 1 }
  0x82   : > { %616 = vrot.lane.b32.xlu1 %v2724_v19, %s2446_s21  ;;  %v710_v19 = vrot.slane %v2790_v12, 2 }
  0x83   : > { %v2929_v34 = vsel %vm554_vm0, %v566_v18, %v3781_v20 }
  0x84   : > { %v711_v35 = vor.u32 %v710_v19, %v709_v16 }
  0x85   : > { %602 = vrot.lane.b32.xlu0 %v567_v25, %s2446_s21 }
  0x86   : > { %618 = vrot.lane.b32.xlu1 %v583_v7, %s2446_s21  ;;  %v712_v46 = vsel %vm684_vm3, %v2744_v40, %v711_v35  ;;  %v716_v16 = vsel %vm684_vm3, %v711_v35, %v2946_v11  ;;  %v2969_v35 = vld [vmem:[%s2497_s19 + $0x80] sm:$0xff]  }
  0x87   : > { %v3002_v8 = vshll.u32 %v2969_v35, 16 }
  0x89   : > { %653 = vrot.lane.b32.xlu0 %v567_v25, %s2445_s20  ;;  %v2952_v25 = vor.u32 %v746_v5, %v745_v48  ;;  %v2972_v48 = vld [vmem:[%s2497_s19 + $0x40] sm:$0xff]  }
  0x8a   : > { %669 = vrot.lane.b32.xlu1 %v583_v7, %s2445_s20  ;;  %v2997_v26 = vshrl.u32 %v2972_v48, 16 }
  0x8b   : > { %v646_v45 = vpop.permute.xlu0 %645  ;;  %v748_v19 = vsel %vm684_vm3, %v743_v44, %v2952_v25  ;;  %v827_v44 = vsel %vm814_vm1, %v824_v3, %v826_v33  ;;  %v969_v3 = vrot.slane %v2914_v6, 2 }
  0x8c   : > { %v593_v10 = vpop.permute.xlu1 %592  ;;  %v973_v52 = vrot.slane %v2997_v26, 2 }
  0x8d   : > { %655 = vrot.lane.b32.xlu0 %v2929_v34, %s2445_s20 }
  0x8e   : > { %671 = vrot.lane.b32.xlu1 %v2936_v62, %s2445_s20 }
  0x8f   : > { %v2948_v18 = vpop.permute.xlu0 %852 }
  0x90   : > { %v595_v7 = vpop.permute.xlu1 %594 }
  0x91   : > { %783 = vrot.lane.b32.xlu0 %v712_v46, %s2449_s28 }
  0x92   : > { %799 = vrot.lane.b32.xlu1 %v744_v47, %s2449_s28 }
  0x93   : > { %v516_v40 = vpop.permute.xlu0 %515 }
  0x94   : > { %v648_v59 = vpop.permute.xlu1 %647  ;;  %v1150_v5 = vsel %vm1148_vm6, %v2516_v14, %v516_v40 }
  0x95   : > { %785 = vrot.lane.b32.xlu0 %v716_v16, %s2449_s28  ;;  %v3791_v16 = vrot.slane %v2972_v48, 2  ;;  %v1187_v14 = vsel %vm1185_vm7, %v1150_v5, %v593_v10  ;;  %v3005_v10 = vshrl.u32 %v2969_v35, 16 }
  0x96   : > { %801 = vrot.lane.b32.xlu1 %v748_v19, %s2449_s28  ;;  %v970_v19 = vrot.slane %v2911_v0, 3  ;;  %v1224_v5 = vsel %vm1222_vm8, %v1187_v14, %v646_v45 }
  0x97   : > { %v518_v49 = vpop.permute.xlu0 %517  ;;  %v3013_v20 = vsel %vm814_vm1, %v826_v33, %v3791_v16  ;;  %v1005_v14 = vrot.slane %v3005_v10, 2  ;;  %v1006_v33 = vrot.slane %v3002_v8, 3 }
  0x98   : > { %v2964_v36 = vpop.permute.xlu1 %854  ;;  %v1152_v40 = vsel %vm1148_vm6, %v2511_v9, %v518_v49  ;;  %v971_v42 = vor.u32 %v970_v19, %v969_v3 }
  0x99   : > { %860 = vrot.lane.b32.xlu0 %v2813_v30, %s2447_s22  ;;  %v843_v30 = vsel %vm814_vm1, %v840_v1, %v842_v38  ;;  %v2994_v1 = vshll.u32 %v2972_v48, 16  ;;  %v1189_v49 = vsel %vm1185_vm7, %v1152_v40, %v595_v7  ;;  %v3042_v40 = vor.u32 %v1006_v33, %v1005_v14 }
  0x9a   : > { %876 = vrot.lane.b32.xlu1 %v2807_v2, %s2447_s22  ;;  %v3790_v2 = vrot.slane %v2969_v35, 2  ;;  %v1100_v14 = vrot.slane %v2891_v50, 3 }
  0x9b   : > { %v776_v46 = vpop.permute.xlu0 %775  ;;  %v974_v61 = vrot.slane %v2994_v1, 3 }
  0x9c   : > { %v778_v47 = vpop.permute.xlu1 %777  ;;  %v1261_v17 = vsel %vm1259_vm9, %v1224_v5, %v776_v46  ;;  %v3022_v45 = vsel %vm814_vm1, %v842_v38, %v3790_v2  ;;  %v1226_v46 = vsel %vm1222_vm8, %v1189_v49, %v648_v59 }
  0x9d   : > { %862 = vrot.lane.b32.xlu0 %v827_v44, %s2447_s22  ;;  %v1298_v3 = vsel %vm1296_vm10, %v1261_v17, %v2948_v18  ;;  %v1263_v59 = vsel %vm1259_vm9, %v1226_v46, %v778_v47 }
  0x9e   : > { %878 = vrot.lane.b32.xlu1 %v843_v30, %s2447_s22 }
  0x9f   : > { %v906_v60 = vpop.permute.xlu0 %905 }
  0xa0   : > { %v908_v9 = vpop.permute.xlu1 %907  ;;  %v1335_v38 = vsel %vm1333_vm11, %v1298_v3, %v906_v60 }
  0xa1   : > { %913 = vrot.lane.b32.xlu0 %v827_v44, %s2450_s4  ;;  %v1003_v44 = vor.u32 %v1002_v31, %v1001_v54  ;;  %v972_v31 = vsel %vm944_vm4, %v2827_v37, %v971_v42  ;;  %v3036_v54 = vor.u32 %v974_v61, %v973_v52  ;;  %v1300_v61 = vsel %vm1296_vm10, %v1263_v59, %v2964_v36 }
  0xa2   : > { %929 = vrot.lane.b32.xlu1 %v843_v30, %s2450_s4  ;;  %v1084_v52 = vrot.slane %v2894_v56, 3  ;;  %v1337_v47 = vsel %vm1333_vm11, %v1300_v61, %v908_v9  ;;  %v3811_v9 = vrot.slane %v2773_v55, 3  ;;  %v3813_v59 = vrot.slane %v2770_v53, 3 }
  0xa3   : > { %v1036_v7 = vpop.permute.xlu0 %1035  ;;  %v1004_v19 = vsel %vm944_vm4, %v2831_v58, %v1003_v44  ;;  %v976_v58 = vsel %vm944_vm4, %v971_v42, %v3036_v54  ;;  %v3788_v61 = vrot.slane %v2994_v1, 1 }
  0xa4   : > { %v1038_v30 = vpop.permute.xlu1 %1037  ;;  %v1372_v17 = vsel %vm1370_vm12, %v1335_v38, %v1036_v7  ;;  %v1008_v7 = vsel %vm944_vm4, %v1003_v44, %v3042_v40  ;;  %v1085_v3 = vsel %vm1074_vm5, %v3811_v9, %v1084_v52  ;;  %v3812_v38 = vrot.slane %v2790_v12, 1 }
  0xa5   : > { %915 = vrot.lane.b32.xlu0 %v3013_v20, %s2450_s4  ;;  %v1374_v36 = vsel %vm1370_vm12, %v1337_v47, %v1038_v30  ;;  %v586_v9 = vrot.slane %v2969_v35, 1 }
  0xa6   : > { %931 = vrot.lane.b32.xlu1 %v3022_v45, %s2450_s4  ;;  %v421_v44 = vor.u32 %v2793_v28, %v3812_v38  ;;  %v3789_v28 = vrot.slane %v2972_v48, 3  ;;  %v3135_v38 = vld [vmem:[%s2497_s19 + $0x88] sm:$0xff]  }
  0xa7   : > { %v1113_v18 = vpop.permute.xlu0 %1112 }
  0xa8   : > { %v3044_v60 = vpop.permute.xlu1 %519  ;;  %v1409_v49 = vsel %vm1407_vm13, %v1372_v17, %v1113_v18  ;;  %v1101_v17 = vsel %vm1074_vm5, %v3813_v59, %v1100_v14  ;;  %v3814_v18 = vrot.slane %v2798_v21, 1  ;;  %v3787_v21 = vrot.slane %v2969_v35, 3 }
  0xa9   : > { %1043 = vrot.lane.b32.xlu0 %v972_v31, %s2451_s5  ;;  %v1446_v37 = vsel %vm1444_vm14, %v1409_v49, 0  ;;  %v425_v31 = vrot.slane %v2911_v0, 1 }
  0xaa   : > { %1059 = vrot.lane.b32.xlu1 %v1004_v19, %s2451_s5  ;;  %2299 = vmatprep.mubr.msk.bf16.mxu0 %vm1495_vm15, %v1446_v37  ;;  %v485_v55 = vor.u32 %v2801_v22, %v3814_v18  ;;  %v489_v19 = vrot.slane %v2919_v13, 1  ;;  %v1087_v22 = vsel %vm1074_vm5, %v1084_v52, %v3789_v28  ;;  %v1103_v47 = vsel %vm1074_vm5, %v1100_v14, %v3787_v21 }
  0xab   : > { %v3057_v5 = vpop.permute.xlu0 %535  ;;  %v426_v12 = vsel %vm366_vm2, %v421_v44, %v425_v31  ;;  %v429_v13 = vor.u32 %v2914_v6, %v425_v31  ;;  %v3138_v44 = vld [vmem:[%s2497_s19 + $0x48] sm:$0xff]   ;;  %v3815_v31 = vrot.slane %v2894_v56, 1  ;;  %v3816_v18 = vrot.slane %v2891_v50, 1 }
  0xac   : > { %v1115_v33 = vpop.permute.xlu1 %1114  ;;  %v490_v53 = vsel %vm366_vm2, %v485_v55, %v489_v19  ;;  %v717_v56 = vrot.slane %v2997_v26, 1  ;;  %v3164_v50 = vshrl.u32 %v3138_v44, 16  ;;  %v1170_v29 = vsel %vm1148_vm6, %v2577_v63, %v3057_v5 }
  0xad   : > { %v1411_v46 = vsel %vm1407_vm13, %v1374_v36, %v1115_v33  ;;  %1045 = vrot.lane.b32.xlu0 %v976_v58, %s2451_s5  ;;  %v3786_v36 = vrot.slane %v3002_v8, 1  ;;  %v434_v6 = vsel %vm366_vm2, %v429_v13, %v3788_v61  ;;  %v587_v55 = vsel %vm554_vm0, %v3816_v18, %v586_v9 }
  0xae   : > { %v1447_v42 = vsel %vm1444_vm14, %v1411_v46, 0  ;;  %1061 = vrot.lane.b32.xlu1 %v1008_v7, %s2451_s5  ;;  %v493_v7 = vor.u32 %v2922_v15, %v489_v19  ;;  %v570_v46 = vrot.slane %v2972_v48, 1  ;;  %v749_v13 = vrot.slane %v3005_v10, 1 }
  0xaf   : > { %2300 = vmatmul.mubr.msk.bf16.vlgmr.msra.gmra.mxu0 %vm1495_vm15, %v1447_v42  ;;  %v3075_v30 = vpop.permute.xlu0 %521  ;;  %v977_v43 = vrot.slane %v3164_v50, 2 }
  0xb0   : > { %v3084_v49 = vpop.permute.xlu1 %537  ;;  %v498_v15 = vsel %vm366_vm2, %v493_v7, %v3786_v36  ;;  %v571_v59 = vsel %vm554_vm0, %v3815_v31, %v570_v46  ;;  %v3171_v7 = vshll.u32 %v3135_v38, 16  ;;  %v721_v36 = vrot.slane %v3164_v50, 1 }
  0xb1   : > { %1120 = vrot.lane.b32.xlu0 %v1085_v3, %s2452_s6 }
  0xb2   : > { %1136 = vrot.lane.b32.xlu1 %v1101_v17, %s2452_s6 }
  0xb3   : > { %v3090_v0 = vpop.permute.xlu0 %596 }
  0xb4   : > { %v3094_v37 = vpop.permute.xlu1 %612 }
  0xb5   : > { %527 = vrot.lane.b32.xlu0 %v426_v12, %s2448_s23  ;;  %v3792_v12 = vrot.slane %v3138_v44, 1 }
  0xb6   : > { %543 = vrot.lane.b32.xlu1 %v490_v53, %s2448_s23  ;;  %v3161_v53 = vshll.u32 %v3138_v44, 16 }
  0xb7   : > { %v3103_v58 = vpop.permute.xlu0 %598  ;;  %v3183_v31 = vsel %vm554_vm0, %v570_v46, %v3792_v12 }
  0xb8   : > { %v3110_v33 = vpop.permute.xlu1 %614  ;;  %v722_v21 = vrot.slane %v3161_v53, 2 }
  0xb9   : > { %1122 = vrot.lane.b32.xlu0 %v1087_v22, %s2452_s6 }
  0xba   : > { %1138 = vrot.lane.b32.xlu1 %v1103_v47, %s2452_s6  ;;  %v750_v47 = vrot.slane %v3002_v8, 2 }
  0xbb   : > { %v3117_v52 = vpop.permute.xlu0 %649 }
  0xbc   : > { %v3122_v14 = vpop.permute.xlu1 %665  ;;  %v751_v2 = vor.u32 %v750_v47, %v749_v13 }
  0xbd   : > { %529 = vrot.lane.b32.xlu0 %v434_v6, %s2448_s23  ;;  %v3174_v6 = vshrl.u32 %v3135_v38, 16 }
  0xbe   : > { %545 = vrot.lane.b32.xlu1 %v498_v15, %s2448_s23 }
  0xbf   : > { %v3127_v42 = vpop.permute.xlu0 %651 }
  0xc0   : > { %v3130_v3 = vpop.permute.xlu1 %667 }
  0xc1   : > { %604 = vrot.lane.b32.xlu0 %v2929_v34, %s2446_s21  ;;  %v3154_v34 = vrot.slane %v3135_v38, 1 }
  0xc2   : > { %620 = vrot.lane.b32.xlu1 %v2936_v62, %s2446_s21  ;;  %v718_v62 = vrot.slane %v2994_v1, 2 }
  0xc3   : > { %v3145_v17 = vpop.permute.xlu0 %779  ;;  %3817 = vst [vmem:[#allocation9_spill] sm:$0xff] %v3154_v34  ;;  %v3189_v28 = vsel %vm554_vm0, %v586_v9, %v3154_v34  ;;  %v752_v9 = vsel %vm684_vm3, %v2952_v25, %v751_v2  ;;  %v830_v25 = vrot.slane %v3138_v44, 2 }
  0xc4   : > { %v3150_v19 = vpop.permute.xlu1 %795  ;;  %v719_v18 = vor.u32 %v718_v62, %v717_v56  ;;  %v3199_v56 = vor.u32 %v722_v21, %v721_v36 }
  0xc5   : > { %606 = vrot.lane.b32.xlu0 %v571_v59, %s2446_s21 }
  0xc6   : > { %622 = vrot.lane.b32.xlu1 %v587_v55, %s2446_s21  ;;  %v720_v46 = vsel %vm684_vm3, %v2946_v11, %v719_v18  ;;  %3818 = vst [vmem:[#allocation10_spill] sm:$0xff] %v3199_v56  ;;  %v724_v12 = vsel %vm684_vm3, %v719_v18, %v3199_v56 }
  0xc7   : > { %v3166_v22 = vpop.permute.xlu0 %781 }
  0xc8   : > { %v3176_v15 = vpop.permute.xlu1 %797 }
  0xc9   : > { %657 = vrot.lane.b32.xlu0 %v571_v59, %s2445_s20  ;;  %v753_v59 = vrot.slane %v3174_v6, 1 }
  0xca   : > { %673 = vrot.lane.b32.xlu1 %v587_v55, %s2445_s20  ;;  %v754_v55 = vrot.slane %v3171_v7, 2 }
  0xcb   : > { %v857_v61 = vpop.permute.xlu0 %856 }
  0xcc   : > { %v873_v16 = vpop.permute.xlu1 %872  ;;  %v3205_v13 = vor.u32 %v754_v55, %v753_v59  ;;  %v846_v55 = vrot.slane %v3135_v38, 2 }
  0xcd   : > { %659 = vrot.lane.b32.xlu0 %v3183_v31, %s2445_s20 }
  0xce   : > { %675 = vrot.lane.b32.xlu1 %v3189_v28, %s2445_s20  ;;  %3819 = vst [vmem:[#allocation11_spill] sm:$0xff] %v3205_v13  ;;  %v756_v21 = vsel %vm684_vm3, %v751_v2, %v3205_v13  ;;  %v3820_v2 = vrot.slane %v2972_v48, 2 }
  0xcf   : > { %v3201_v62 = vpop.permute.xlu0 %858 }
  0xd0   : > { %v3207_v47 = vpop.permute.xlu1 %874 }
  0xd1   : > { %787 = vrot.lane.b32.xlu0 %v720_v46, %s2449_s28 }
  0xd2   : > { %803 = vrot.lane.b32.xlu1 %v752_v9, %s2449_s28  ;;  %v3224_v9 = vld [vmem:[%s2497_s19 + $0x90] sm:$0xff]  }
  0xd3   : > { %v910_v11 = vpop.permute.xlu0 %909  ;;  %v3237_v51 = vrot.slane %v3224_v9, 2  ;;  %v758_v56 = vshrl.u32 %v3224_v9, 16  ;;  %v761_v57 = vshll.u32 %v3224_v9, 16 }
  0xd4   : > { %v926_v36 = vpop.permute.xlu1 %925 }
  0xd5   : > { %789 = vrot.lane.b32.xlu0 %v724_v12, %s2449_s28  ;;  %v831_v12 = vsel %vm814_vm1, %v3820_v2, %v830_v25  ;;  %v1010_v2 = vrot.slane %v3171_v7, 3 }
  0xd6   : > { %805 = vrot.lane.b32.xlu1 %v756_v21, %s2449_s28  ;;  %v3821_v21 = vrot.slane %v2969_v35, 2 }
  0xd7   : > { %v3218_v59 = vpop.permute.xlu0 %911 }
  0xd8   : > { %v3221_v46 = vpop.permute.xlu1 %927  ;;  %v847_v39 = vsel %vm814_vm1, %v3821_v21, %v846_v55  ;;  %v978_v21 = vrot.slane %v3161_v53, 3 }
  0xd9   : > { %864 = vrot.lane.b32.xlu0 %v3013_v20, %s2447_s22  ;;  %v1009_v20 = vrot.slane %v3174_v6, 2 }
  0xda   : > { %880 = vrot.lane.b32.xlu1 %v3022_v45, %s2447_s22  ;;  %v1154_v45 = vsel %vm1148_vm6, %v2506_v4, %v3044_v60  ;;  %v1207_v4 = vsel %vm1185_vm7, %v1170_v29, %v3094_v37  ;;  %v3822_v29 = vrot.slane %v2577_v63, 2 }
  0xdb   : > { %v1040_v18 = vpop.permute.xlu0 %1039  ;;  %v1191_v32 = vsel %vm1185_vm7, %v1154_v45, %v3090_v0  ;;  %v1244_v34 = vsel %vm1222_vm8, %v1207_v4, %v3122_v14  ;;  %v3266_v45 = vsel %vm814_vm1, %v846_v55, %v3237_v51  ;;  %v1011_v14 = vor.u32 %v1010_v2, %v1009_v20 }
  0xdc   : > { %v1056_v41 = vpop.permute.xlu1 %1055  ;;  %v1228_v60 = vsel %vm1222_vm8, %v1191_v32, %v3117_v52  ;;  %v3271_v32 = vsel %vm814_vm1, %v830_v25, %v3822_v29  ;;  %v1281_v37 = vsel %vm1259_vm9, %v1244_v34, %v3150_v19  ;;  %v982_v25 = vrot.slane %v2607_v24, 3 }
  0xdd   : > { %866 = vrot.lane.b32.xlu0 %v831_v12, %s2447_s22  ;;  %v1265_v5 = vsel %vm1259_vm9, %v1228_v60, %v3145_v17  ;;  %v979_v17 = vor.u32 %v978_v21, %v977_v43  ;;  %v1318_v4 = vsel %vm1296_vm10, %v1281_v37, %v873_v16  ;;  %v981_v60 = vrot.slane %v2619_v27, 2 }
  0xde   : > { %882 = vrot.lane.b32.xlu1 %v847_v39, %s2447_s22  ;;  %v1302_v52 = vsel %vm1296_vm10, %v1265_v5, %v857_v61  ;;  %v1355_v29 = vsel %vm1333_vm11, %v1318_v4, %v926_v36  ;;  %v1013_v34 = vrot.slane %v758_v56, 2  ;;  %v1014_v43 = vrot.slane %v761_v57, 3 }
  0xdf   : > { %v1042_v13 = vpop.permute.xlu0 %1041  ;;  %v1339_v55 = vsel %vm1333_vm11, %v1302_v52, %v910_v11  ;;  %v1392_v16 = vsel %vm1370_vm12, %v1355_v29, %v1056_v41  ;;  %v980_v2 = vsel %vm944_vm4, %v3036_v54, %v979_v17  ;;  %v1172_v41 = vsel %vm1148_vm6, %v2604_v23, %v3084_v49 }
  0xe0   : > { %v1058_v0 = vpop.permute.xlu1 %1057  ;;  %v1376_v19 = vsel %vm1370_vm12, %v1339_v55, %v1040_v18  ;;  %v3308_v5 = vor.u32 %v982_v25, %v981_v60  ;;  %v1209_v37 = vsel %vm1185_vm7, %v1172_v41, %v3110_v33  ;;  %v3319_v52 = vor.u32 %v1014_v43, %v1013_v34 }
  0xe1   : > { %917 = vrot.lane.b32.xlu0 %v831_v12, %s2450_s4  ;;  %v2408_v12 = vld [vmem:[%s2497_s19 + $0x18] sm:$0xff]   ;;  %v1246_v4 = vsel %vm1222_vm8, %v1209_v37, %v3130_v3 }
  0xe2   : > { %933 = vrot.lane.b32.xlu1 %v847_v39, %s2450_s4  ;;  %v1156_v20 = vsel %vm1148_vm6, %v2408_v12, %v3075_v30  ;;  %v1283_v33 = vsel %vm1259_vm9, %v1246_v4, %v3176_v15  ;;  %v984_v3 = vsel %vm944_vm4, %v979_v17, %v3308_v5  ;;  %v3825_v12 = vrot.slane %v2969_v35, 3 }
  0xe3   : > { %v1117_v61 = vpop.permute.xlu0 %1116  ;;  %v1193_v21 = vsel %vm1185_vm7, %v1156_v20, %v3103_v58  ;;  %v1012_v58 = vsel %vm944_vm4, %v3042_v40, %v1011_v14  ;;  %v1320_v40 = vsel %vm1296_vm10, %v1283_v33, %v3207_v47  ;;  %v1104_v47 = vrot.slane %v3135_v38, 3 }
  0xe4   : > { %v1133_v11 = vpop.permute.xlu1 %1132  ;;  %v1413_v39 = vsel %vm1407_vm13, %v1376_v19, %v1117_v61  ;;  %v1230_v54 = vsel %vm1222_vm8, %v1193_v21, %v3127_v42  ;;  %v1357_v15 = vsel %vm1333_vm11, %v1320_v40, %v3221_v46  ;;  %v1016_v19 = vsel %vm944_vm4, %v1011_v14, %v3319_v52 }
  0xe5   : > { %v1448_v36 = vsel %vm1444_vm14, %v1413_v39, 0  ;;  %919 = vrot.lane.b32.xlu0 %v3271_v32, %s2450_s4  ;;  %v1429_v18 = vsel %vm1407_vm13, %v1392_v16, %v1133_v11  ;;  %v1267_v55 = vsel %vm1259_vm9, %v1230_v54, %v3166_v22  ;;  %v1088_v22 = vrot.slane %v3138_v44, 3 }
  0xe6   : > { %935 = vrot.lane.b32.xlu1 %v3266_v45, %s2450_s4  ;;  %2303 = vmatprep.mubr.msk.bf16.mxu0 %vm1495_vm15, %v1448_v36  ;;  %v1456_v30 = vsel %vm1444_vm14, %v1429_v18, 0  ;;  %v1304_v42 = vsel %vm1296_vm10, %v1267_v55, %v3201_v62  ;;  %v3823_v46 = vrot.slane %v2972_v48, 3  ;;  %v3824_v14 = vrot.slane %v2994_v1, 1 }
  0xe7   : > { %2319 = vmatprep.mubr.msk.bf16.mxu1 %vm1495_vm15, %v1456_v30  ;;  %v3315_v49 = vpop.permute.xlu0 %523  ;;  %v1341_v25 = vsel %vm1333_vm11, %v1304_v42, %v3218_v59  ;;  %v1394_v59 = vsel %vm1370_vm12, %v1357_v15, %v1058_v0  ;;  %v441_v11 = vrot.slane %v3161_v53, 1  ;;  %v1105_v20 = vsel %vm1074_vm5, %v3825_v12, %v1104_v47  ;;  %v3378_v53 = vld [vmem:[%s2497_s19 + $0x50] sm:$0xff]  }
  0xe8   : > { %v3325_v60 = vpop.permute.xlu1 %539  ;;  %v1378_v62 = vsel %vm1370_vm12, %v1341_v25, %v1042_v13  ;;  %v1089_v0 = vsel %vm1074_vm5, %v3823_v46, %v1088_v22  ;;  %v437_v16 = vor.u32 %v2997_v26, %v3824_v14  ;;  %v3826_v36 = vrot.slane %v3002_v8, 1 }
  0xe9   : > { %1047 = vrot.lane.b32.xlu0 %v980_v2, %s2451_s5  ;;  %v505_v18 = vrot.slane %v3171_v7, 1  ;;  %v2402_v2 = vld [vmem:[%s2497_s19 + $0x90] ss:$0 sps:$4 sm:$0x11]   ;;  %v1090_v35 = vrot.slane %v3378_v53, 3  ;;  %v445_v37 = vor.u32 %v3164_v50, %v441_v11  ;;  %v3827_v42 = vrot.slane %v2607_v24, 1 }
  0xea   : > { %1063 = vrot.lane.b32.xlu1 %v1012_v58, %s2451_s5  ;;  %v501_v48 = vor.u32 %v3005_v10, %v3826_v36  ;;  %v442_v26 = vsel %vm366_vm2, %v437_v16, %v441_v11  ;;  %v1106_v10 = vrot.slane %v3224_v9, 3  ;;  %v511_v7 = vshll.u32 %v2402_v2, 16 }
  0xeb   : > { %v1119_v29 = vpop.permute.xlu0 %1118  ;;  %v1091_v30 = vsel %vm1074_vm5, %v1088_v22, %v1090_v35  ;;  %v509_v4 = vor.u32 %v3174_v6, %v505_v18  ;;  %v450_v50 = vsel %vm366_vm2, %v445_v37, %v3827_v42  ;;  %v590_v22 = vrot.slane %v2402_v2, 1  ;;  %v3833_v37 = vld [vmem:[#allocation11_spill] sm:$0xff]  ;;  %v3834_v42 = vld [vmem:[#allocation6_spill] sm:$0xff] }
  0xec   : > { %v1135_v61 = vpop.permute.xlu1 %1134  ;;  %v1415_v34 = vsel %vm1407_vm13, %v1378_v62, %v1119_v29  ;;  %v506_v8 = vsel %vm366_vm2, %v501_v48, %v505_v18  ;;  %v1107_v58 = vsel %vm1074_vm5, %v1104_v47, %v1106_v10  ;;  %v513_v55 = vrot.slane %v511_v7, 1 }
  0xed   : > { %v1431_v17 = vsel %vm1407_vm13, %v1394_v59, %v1135_v61  ;;  %v1449_v43 = vsel %vm1444_vm14, %v1415_v34, 0  ;;  %1049 = vrot.lane.b32.xlu0 %v984_v3, %s2451_s5  ;;  %v3828_v62 = vrot.slane %v2577_v63, 1  ;;  %v3829_v29 = vrot.slane %v3138_v44, 1  ;;  %v2403_v59 = vld [vmem:[%s2497_s19 + $0x98] ss:$0 sps:$4 sm:$0x11]  }
  0xee   : > { %v1457_v13 = vsel %vm1444_vm14, %v1431_v17, 0  ;;  %1065 = vrot.lane.b32.xlu1 %v1016_v19, %s2451_s5  ;;  %2304 = vmatmul.mubr.msk.bf16.gmra.mxu0 %vm1495_vm15, %v1449_v43  ;;  %v514_v25 = vsel %vm366_vm2, %v509_v4, %v513_v55  ;;  %v641_v47 = vrot.slane %v3224_v9, 1  ;;  %v3830_v34 = vld [vmem:[#allocation9_spill] sm:$0xff]  ;;  %v725_v46 = vrot.slane %v2619_v27, 1 }
  0xef   : > { %2320 = vmatmul.mubr.msk.bf16.vlgmr.msra.gmra.mxu1 %vm1495_vm15, %v1457_v13  ;;  %v3362_v39 = vpop.permute.xlu0 %525  ;;  %v575_v19 = vsel %vm554_vm0, %v3829_v29, %v3828_v62  ;;  %v591_v17 = vsel %vm554_vm0, %v3830_v34, %v590_v22  ;;  %v2404_v43 = vld [vmem:[%s2497_s19 + $0x98] ss:$0 sps:$4 sm:$0x33]   ;;  %v760_v16 = vrot.slane %v758_v56, 1  ;;  %v763_v11 = vrot.slane %v761_v57, 2  ;;  %v3832_v57 = vld [vmem:[#allocation10_spill] sm:$0xff] }
  0xf0   : > { %v3372_v1 = vpop.permute.xlu1 %541  ;;  %v767_v12 = vshrl.u32 %v2404_v43, 16  ;;  %v3469_v29 = vld [vmem:[%s2497_s19 + $0x98] sm:$0xff]  }
  0xf1   : > { %1124 = vrot.lane.b32.xlu0 %v1089_v0, %s2452_s6  ;;  %v726_v0 = vrot.slane %v2607_v24, 2  ;;  %v764_v18 = vor.u32 %v763_v11, %v760_v16 }
  0xf2   : > { %1140 = vrot.lane.b32.xlu1 %v1105_v20, %s2452_s6  ;;  %v770_v20 = vshll.u32 %v2404_v43, 16  ;;  %v769_v2 = vrot.slane %v767_v12, 1 }
  0xf3   : > { %v3381_v41 = vpop.permute.xlu0 %600  ;;  %v727_v48 = vor.u32 %v726_v0, %v725_v46  ;;  %v3835_v46 = vrot.slane %v2604_v23, 2 }
  0xf4   : > { %v3385_v21 = vpop.permute.xlu1 %616 }
  0xf5   : > { %531 = vrot.lane.b32.xlu0 %v442_v26, %s2448_s23  ;;  %v772_v26 = vrot.slane %v770_v20, 2  ;;  %v728_v7 = vsel %vm684_vm3, %v3832_v57, %v727_v48  ;;  %v3838_v57 = vld [vmem:[#allocation2_spill] sm:$0xff] }
  0xf6   : > { %547 = vrot.lane.b32.xlu1 %v506_v8, %s2448_s23  ;;  %v3831_v8 = vld [vmem:[#allocation5_spill] sm:$0xff] }
  0xf7   : > { %v3393_v54 = vpop.permute.xlu0 %602  ;;  %v773_v4 = vor.u32 %v772_v26, %v769_v2 }
  0xf8   : > { %v3399_v33 = vpop.permute.xlu1 %618 }
  0xf9   : > { %1126 = vrot.lane.b32.xlu0 %v1091_v30, %s2452_s6  ;;  %v774_v22 = vsel %vm684_vm3, %v764_v18, %v773_v4 }
  0xfa   : > { %1142 = vrot.lane.b32.xlu1 %v1107_v58, %s2452_s6  ;;  %v765_v58 = vsel %vm684_vm3, %v3833_v37, %v764_v18  ;;  %v2411_v18 = vld [vmem:[%s2497_s19 + $0x60] sm:$0xff]  }
  0xfb   : > { %v3406_v40 = vpop.permute.xlu0 %653  ;;  %v1174_v2 = vsel %vm1148_vm6, %v2411_v18, %v3325_v60 }
  0xfc   : > { %v3409_v3 = vpop.permute.xlu1 %669 }
  0xfd   : > { %533 = vrot.lane.b32.xlu0 %v450_v50, %s2448_s23  ;;  %v732_v50 = vsel %vm684_vm3, %v727_v48, %v3834_v42  ;;  %v2410_v48 = vld [vmem:[%s2497_s19 + $0x20] sm:$0xff]  }
  0xfe   : > { %549 = vrot.lane.b32.xlu1 %v514_v25, %s2448_s23 }
  0xff   : > { %v3413_v6 = vpop.permute.xlu0 %655 }
 0x100   : > { %v3415_v15 = vpop.permute.xlu1 %671 }
 0x101   : > { %608 = vrot.lane.b32.xlu0 %v3183_v31, %s2446_s21  ;;  %v643_v31 = vrot.slane %v2403_v59, 1 }
 0x102   : > { %624 = vrot.lane.b32.xlu1 %v3189_v28, %s2446_s21  ;;  %v642_v28 = vsel %vm554_vm0, %v3830_v34, %v641_v47  ;;  %v901_v34 = vrot.slane %v3469_v29, 2 }
 0x103   : > { %v3428_v61 = vpop.permute.xlu0 %783  ;;  %v644_v24 = vsel %vm554_vm0, %v641_v47, %v643_v31  ;;  %v850_v47 = vrot.slane %v2404_v43, 2  ;;  %v1021_v31 = vshll.u32 %v3469_v29, 16  ;;  %v3836_v43 = vrot.slane %v2577_v63, 2 }
 0x104   : > { %v3433_v13 = vpop.permute.xlu1 %799  ;;  %v902_v20 = vsel %vm814_vm1, %v3237_v51, %v901_v34 }
 0x105   : > { %610 = vrot.lane.b32.xlu0 %v575_v19, %s2446_s21  ;;  %v835_v0 = vsel %vm814_vm1, %v3836_v43, %v3835_v46  ;;  %v851_v11 = vsel %vm814_vm1, %v3237_v51, %v850_v47 }
 0x106   : > { %626 = vrot.lane.b32.xlu1 %v591_v17, %s2446_s21  ;;  %v2406_v17 = vld [vmem:[%s2497_s19 + $0xa0] ss:$0 sps:$4 sm:$0x33]  }
 0x107   : > { %v3441_v14 = vpop.permute.xlu0 %785  ;;  %v903_v23 = vrot.slane %v2406_v17, 2 }
 0x108   : > { %v3447_v36 = vpop.permute.xlu1 %801 }
 0x109   : > { %661 = vrot.lane.b32.xlu0 %v575_v19, %s2445_s20 }
 0x10a   : > { %677 = vrot.lane.b32.xlu1 %v642_v28, %s2445_s20  ;;  %v1018_v28 = vshrl.u32 %v3469_v29, 16 }
 0x10b   : > { %v861_v27 = vpop.permute.xlu0 %860 }
 0x10c   : > { %v877_v56 = vpop.permute.xlu1 %876  ;;  %v1020_v63 = vrot.slane %v1018_v28, 2 }
 0x10d   : > { %663 = vrot.lane.b32.xlu0 %v3831_v8, %s2445_s20  ;;  %v3837_v8 = vld [vmem:[#allocation4_spill] sm:$0xff] }
 0x10e   : > { %679 = vrot.lane.b32.xlu1 %v644_v24, %s2445_s20  ;;  %v1023_v24 = vrot.slane %v1021_v31, 3  ;;  %v985_v51 = vrot.slane %v3837_v8, 2  ;;  %v2414_v8 = vld [vmem:[%s2497_s19 + $0x58] sm:$0xff]  }
 0x10f   : > { %v3457_v30 = vpop.permute.xlu0 %862 }
 0x110   : > { %v3461_v55 = vpop.permute.xlu1 %878 }
 0x111   : > { %791 = vrot.lane.b32.xlu0 %v728_v7, %s2449_s28  ;;  %v986_v7 = vrot.slane %v3838_v57, 3 }
 0x112   : > { %807 = vrot.lane.b32.xlu1 %v765_v58, %s2449_s28 }
 0x113   : > { %v914_v25 = vpop.permute.xlu0 %913 }
 0x114   : > { %v930_v62 = vpop.permute.xlu1 %929 }
 0x115   : > { %793 = vrot.lane.b32.xlu0 %v732_v50, %s2449_s28 }
 0x116   : > { %809 = vrot.lane.b32.xlu1 %v774_v22, %s2449_s28 }
 0x117   : > { %v3473_v19 = vpop.permute.xlu0 %915 }
 0x118   : > { %v3475_v59 = vpop.permute.xlu1 %931 }
 0x119   : > { %868 = vrot.lane.b32.xlu0 %v3271_v32, %s2447_s22  ;;  %v3493_v32 = vld [vmem:[%s2497_s19 + $0xa0] ss:$0 sps:$4 sm:$0x77]  }
 0x11a   : > { %884 = vrot.lane.b32.xlu1 %v3266_v45, %s2447_s22  ;;  %v1158_v45 = vsel %vm1148_vm6, %v2410_v48, %v3315_v49  ;;  %v1211_v49 = vsel %vm1185_vm7, %v1174_v2, %v3385_v21  ;;  %v1027_v4 = vshrl.u32 %v3493_v32, 16  ;;  %v1030_v60 = vshll.u32 %v3493_v32, 16 }
 0x11b   : > { %v1044_v16 = vpop.permute.xlu0 %1043  ;;  %v1195_v26 = vsel %vm1185_vm7, %v1158_v45, %v3381_v41  ;;  %v1248_v41 = vsel %vm1222_vm8, %v1211_v49, %v3409_v3  ;;  %v1024_v3 = vor.u32 %v1023_v24, %v1020_v63 }
 0x11c   : > { %v1060_v12 = vpop.permute.xlu1 %1059  ;;  %v1232_v37 = vsel %vm1222_vm8, %v1195_v26, %v3406_v40  ;;  %v1285_v22 = vsel %vm1259_vm9, %v1248_v41, %v3433_v13  ;;  %v904_v40 = vsel %vm814_vm1, %v901_v34, %v903_v23  ;;  %v1032_v46 = vrot.slane %v1030_v60, 3 }
 0x11d   : > { %870 = vrot.lane.b32.xlu0 %v835_v0, %s2447_s22  ;;  %v1269_v42 = vsel %vm1259_vm9, %v1232_v37, %v3428_v61  ;;  %v1322_v47 = vsel %vm1296_vm10, %v1285_v22, %v877_v56  ;;  %v987_v61 = vor.u32 %v986_v7, %v985_v51  ;;  %v2412_v56 = vld [vmem:[%s2497_s19 + $0x28] sm:$0xff]   ;;  %v1092_v51 = vrot.slane %v2414_v8, 3 }
 0x11e   : > { %886 = vrot.lane.b32.xlu1 %v851_v11, %s2447_s22  ;;  %v1306_v21 = vsel %vm1296_vm10, %v1269_v42, %v861_v27  ;;  %v1359_v28 = vsel %vm1333_vm11, %v1322_v47, %v930_v62  ;;  %v1029_v27 = vrot.slane %v1027_v4, 2  ;;  %v3839_v62 = vld [vmem:[#allocation7_spill] sm:$0xff]  ;;  %v1110_v42 = vrot.slane %v3493_v32, 3 }
 0x11f   : > { %v1046_v58 = vpop.permute.xlu0 %1045  ;;  %v1343_v17 = vsel %vm1333_vm11, %v1306_v21, %v914_v25  ;;  %v1396_v43 = vsel %vm1370_vm12, %v1359_v28, %v1060_v12  ;;  %v1160_v25 = vsel %vm1148_vm6, %v2412_v56, %v3362_v39  ;;  %v988_v39 = vsel %vm944_vm4, %v3308_v5, %v987_v61  ;;  %v3841_v22 = vld [vmem:[#allocation3_spill] sm:$0xff] }
 0x120   : > { %v1062_v50 = vpop.permute.xlu1 %1061  ;;  %v1380_v13 = vsel %vm1370_vm12, %v1343_v17, %v1044_v16  ;;  %v2413_v16 = vld [vmem:[%s2497_s19 + $0x68] sm:$0xff]   ;;  %v1197_v12 = vsel %vm1185_vm7, %v1160_v25, %v3393_v54  ;;  %v1025_v54 = vsel %vm944_vm4, %v3319_v52, %v1024_v3  ;;  %v1033_v24 = vor.u32 %v1032_v46, %v1029_v27 }
 0x121   : > { %921 = vrot.lane.b32.xlu0 %v835_v0, %s2450_s4  ;;  %v1176_v48 = vsel %vm1148_vm6, %v2413_v16, %v3372_v1  ;;  %v1234_v63 = vsel %vm1222_vm8, %v1197_v12, %v3413_v6  ;;  %v3842_v21 = vrot.slane %v3841_v22, 3 }
 0x122   : > { %937 = vrot.lane.b32.xlu1 %v902_v20, %s2450_s4  ;;  %v1213_v23 = vsel %vm1185_vm7, %v1176_v48, %v3399_v33  ;;  %v1271_v5 = vsel %vm1259_vm9, %v1234_v63, %v3441_v14  ;;  %v1034_v7 = vsel %vm944_vm4, %v1024_v3, %v1033_v24  ;;  %v2415_v48 = vld [vmem:[%s2497_s19 + $0x30] sm:$0xff]  }
 0x123   : > { %v1121_v31 = vpop.permute.xlu0 %1120  ;;  %v1250_v18 = vsel %vm1222_vm8, %v1213_v23, %v3415_v15  ;;  %v1308_v6 = vsel %vm1296_vm10, %v1271_v5, %v3457_v30  ;;  %v3840_v15 = vld [vmem:[#allocation8_spill] sm:$0xff]  ;;  %v1095_v53 = vsel %vm1074_vm5, %v1092_v51, %v3842_v21 }
 0x124   : > { %v1137_v0 = vpop.permute.xlu1 %1136  ;;  %v1417_v34 = vsel %vm1407_vm13, %v1380_v13, %v1121_v31  ;;  %v1287_v33 = vsel %vm1259_vm9, %v1250_v18, %v3447_v36  ;;  %v1345_v52 = vsel %vm1333_vm11, %v1308_v6, %v3473_v19  ;;  %v992_v14 = vsel %vm944_vm4, %v987_v61, %v3840_v15 }
 0x125   : > { %v1433_v11 = vsel %vm1407_vm13, %v1396_v43, %v1137_v0  ;;  %v1450_v20 = vsel %vm1444_vm14, %v1417_v34, 0  ;;  %923 = vrot.lane.b32.xlu0 %v3839_v62, %s2450_s4  ;;  %v1324_v26 = vsel %vm1296_vm10, %v1287_v33, %v3461_v55  ;;  %v1382_v30 = vsel %vm1370_vm12, %v1345_v52, %v1046_v58 }
 0x126   : > { %v1458_v45 = vsel %vm1444_vm14, %v1433_v11, 0  ;;  %939 = vrot.lane.b32.xlu1 %v904_v40, %s2450_s4  ;;  %2307 = vmatprep.mubr.msk.bf16.mxu0 %vm1495_vm15, %v1450_v20  ;;  %v1361_v36 = vsel %vm1333_vm11, %v1324_v26, %v3475_v59  ;;  %v1108_v55 = vrot.slane %v3469_v29, 3  ;;  %v1093_v29 = vsel %vm1074_vm5, %v1090_v35, %v1092_v51 }
 0x127   : > { %2323 = vmatprep.mubr.msk.bf16.mxu1 %vm1495_vm15, %v1458_v45  ;;  %v3553_v1 = vpop.permute.xlu0 %527  ;;  %v1398_v49 = vsel %vm1370_vm12, %v1361_v36, %v1062_v50  ;;  %v2416_v45 = vld [vmem:[%s2497_s19 + $0x70] sm:$0xff]  }
 0x128   : > { %v544_v2 = vpop.permute.xlu1 %543  ;;  %v1109_v41 = vsel %vm1074_vm5, %v1106_v10, %v1108_v55  ;;  %v1111_v35 = vsel %vm1074_vm5, %v1108_v55, %v1110_v42  ;;  %v1162_v12 = vsel %vm1148_vm6, %v2415_v48, %v3553_v1 }
 0x129   : > { %1051 = vrot.lane.b32.xlu0 %v988_v39, %s2451_s5  ;;  %v1178_v39 = vsel %vm1148_vm6, %v2416_v45, %v544_v2 }
 0x12a   : > { %1067 = vrot.lane.b32.xlu1 %v1025_v54, %s2451_s5 }
 0x12b   : > { %v1123_v57 = vpop.permute.xlu0 %1122 }
 0x12c   : > { %v1139_v19 = vpop.permute.xlu1 %1138  ;;  %v1419_v37 = vsel %vm1407_vm13, %v1382_v30, %v1123_v57  ;;  %v2417_v30 = vld [vmem:[%s2497_s19 + $0x38] sm:$0xff]  }
 0x12d   : > { %v1435_v4 = vsel %vm1407_vm13, %v1398_v49, %v1139_v19  ;;  %v1451_v60 = vsel %vm1444_vm14, %v1419_v37, 0  ;;  %1053 = vrot.lane.b32.xlu0 %v992_v14, %s2451_s5  ;;  %v2418_v49 = vld [vmem:[%s2497_s19 + $0x78] sm:$0xff]  }
 0x12e   : > { %v1459_v59 = vsel %vm1444_vm14, %v1435_v4, 0  ;;  %1069 = vrot.lane.b32.xlu1 %v1034_v7, %s2451_s5  ;;  %2308 = vmatmul.mubr.msk.bf16.gmra.mxu0 %vm1495_vm15, %v1451_v60 }
 0x12f   : > { %2324 = vmatmul.mubr.msk.bf16.gmra.mxu1 %vm1495_vm15, %v1459_v59  ;;  %v530_v58 = vpop.permute.xlu0 %529 }
 0x130   : > { %v546_v50 = vpop.permute.xlu1 %545  ;;  %v1164_v57 = vsel %vm1148_vm6, %v2417_v30, %v530_v58 }
 0x131   : > { %1128 = vrot.lane.b32.xlu0 %v1093_v29, %s2452_s6  ;;  %v1180_v19 = vsel %vm1148_vm6, %v2418_v49, %v546_v50  ;;  %v2419_v49 = vld [vmem:[%s2497_s19 + $0x40] sm:$0xff]  }
 0x132   : > { %1144 = vrot.lane.b32.xlu1 %v1109_v41, %s2452_s6 }
 0x133   : > { %v605_v40 = vpop.permute.xlu0 %604 }
 0x134   : > { %v621_v47 = vpop.permute.xlu1 %620  ;;  %v1199_v23 = vsel %vm1185_vm7, %v1162_v12, %v605_v40 }
 0x135   : > { %1130 = vrot.lane.b32.xlu0 %v1095_v53, %s2452_s6  ;;  %v1215_v63 = vsel %vm1185_vm7, %v1178_v39, %v621_v47 }
 0x136   : > { %1146 = vrot.lane.b32.xlu1 %v1111_v35, %s2452_s6 }
 0x137   : > { %v607_v9 = vpop.permute.xlu0 %606 }
 0x138   : > { %v623_v10 = vpop.permute.xlu1 %622  ;;  %v1201_v37 = vsel %vm1185_vm7, %v1164_v57, %v607_v9 }
 0x139   : > { %v1217_v60 = vsel %vm1185_vm7, %v1180_v19, %v623_v10 }
 0x13b   : > { %v658_v32 = vpop.permute.xlu0 %657 }
 0x13c   : > { %v674_v17 = vpop.permute.xlu1 %673  ;;  %v1236_v54 = vsel %vm1222_vm8, %v1199_v23, %v658_v32 }
 0x13d   : > { %v1252_v18 = vsel %vm1222_vm8, %v1215_v63, %v674_v17 }
 0x13f   : > { %v660_v3 = vpop.permute.xlu0 %659 }
 0x140   : > { %v676_v61 = vpop.permute.xlu1 %675  ;;  %v1238_v59 = vsel %vm1222_vm8, %v1201_v37, %v660_v3  ;;  %v2420_v37 = vld [vmem:[%s2497_s19 + $0x80] sm:$0xff]  }
 0x141   : > { %v1254_v58 = vsel %vm1222_vm8, %v1217_v60, %v676_v61 }
 0x143   : > { %v788_v28 = vpop.permute.xlu0 %787 }
 0x144   : > { %v804_v13 = vpop.permute.xlu1 %803  ;;  %v1273_v5 = vsel %vm1259_vm9, %v1236_v54, %v788_v28 }
 0x145   : > { %v1289_v6 = vsel %vm1259_vm9, %v1252_v18, %v804_v13  ;;  %v3654_v13 = vld [vmem:[%s3774_s2] ss:$0 sm:$0xff] }
 0x147   : > { %v790_v31 = vpop.permute.xlu0 %789 }
 0x148   : > { %v806_v27 = vpop.permute.xlu1 %805  ;;  %v1275_v41 = vsel %vm1259_vm9, %v1238_v59, %v790_v31 }
 0x149   : > { %v1291_v50 = vsel %vm1259_vm9, %v1254_v58, %v806_v27 }
 0x14b   : > { %v865_v46 = vpop.permute.xlu0 %864 }
 0x14c   : > { %v881_v43 = vpop.permute.xlu1 %880  ;;  %v1310_v1 = vsel %vm1296_vm10, %v1273_v5, %v865_v46 }
 0x14d   : > { %v1326_v2 = vsel %vm1296_vm10, %v1289_v6, %v881_v43 }
 0x14f   : > { %v867_v0 = vpop.permute.xlu0 %866 }
 0x150   : > { %v883_v34 = vpop.permute.xlu1 %882  ;;  %v1312_v22 = vsel %vm1296_vm10, %v1275_v41, %v867_v0 }
 0x151   : > { %v1328_v21 = vsel %vm1296_vm10, %v1291_v50, %v883_v34 }
 0x153   : > { %v918_v56 = vpop.permute.xlu0 %917 }
 0x154   : > { %v934_v25 = vpop.permute.xlu1 %933  ;;  %v1347_v26 = vsel %vm1333_vm11, %v1310_v1, %v918_v56 }
 0x155   : > { %v1363_v52 = vsel %vm1333_vm11, %v1326_v2, %v934_v25 }
 0x157   : > { %v920_v11 = vpop.permute.xlu0 %919 }
 0x158   : > { %v936_v20 = vpop.permute.xlu1 %935  ;;  %v1349_v53 = vsel %vm1333_vm11, %v1312_v22, %v920_v11 }
 0x159   : > { %v1365_v40 = vsel %vm1333_vm11, %v1328_v21, %v936_v20 }
 0x15b   : > { %v1048_v62 = vpop.permute.xlu0 %1047 }
 0x15c   : > { %v1064_v16 = vpop.permute.xlu1 %1063  ;;  %v1384_v15 = vsel %vm1370_vm12, %v1347_v26, %v1048_v62 }
 0x15d   : > { %v1400_v8 = vsel %vm1370_vm12, %v1363_v52, %v1064_v16 }
 0x15f   : > { %v1050_v24 = vpop.permute.xlu0 %1049 }
 0x160   : > { %v1066_v33 = vpop.permute.xlu1 %1065  ;;  %v1386_v35 = vsel %vm1370_vm12, %v1349_v53, %v1050_v24 }
 0x161   : > { %v1402_v9 = vsel %vm1370_vm12, %v1365_v40, %v1066_v33 }
 0x163   : > { %v1125_v14 = vpop.permute.xlu0 %1124 }
 0x164   : > { %v1141_v51 = vpop.permute.xlu1 %1140  ;;  %v1421_v36 = vsel %vm1407_vm13, %v1384_v15, %v1125_v14 }
 0x165   : > { %v1437_v7 = vsel %vm1407_vm13, %v1400_v8, %v1141_v51  ;;  %v1452_v55 = vsel %vm1444_vm14, %v1421_v36, 0 }
 0x166   : > { %v1460_v4 = vsel %vm1444_vm14, %v1437_v7, 0  ;;  %2311 = vmatprep.mubr.msk.bf16.mxu0 %vm1495_vm15, %v1452_v55 }
 0x167   : > { %2327 = vmatprep.mubr.msk.bf16.mxu1 %vm1495_vm15, %v1460_v4  ;;  %v3633_v29 = vpop.permute.xlu0 %531 }
 0x168   : > { %v3637_v42 = vpop.permute.xlu1 %547  ;;  %v1166_v19 = vsel %vm1148_vm6, %v2419_v49, %v3633_v29 }
 0x169   : > { %v1182_v4 = vsel %vm1148_vm6, %v2420_v37, %v3637_v42 }
 0x16b   : > { %v1127_v47 = vpop.permute.xlu0 %1126 }
 0x16c   : > { %v1143_v10 = vpop.permute.xlu1 %1142  ;;  %v1423_v32 = vsel %vm1407_vm13, %v1386_v35, %v1127_v47 }
 0x16d   : > { %v1439_v17 = vsel %vm1407_vm13, %v1402_v9, %v1143_v10  ;;  %v1453_v3 = vsel %vm1444_vm14, %v1423_v32, 0 }
 0x16e   : > { %v1461_v61 = vsel %vm1444_vm14, %v1439_v17, 0  ;;  %2312 = vmatmul.mubr.msk.bf16.gmra.mxu0 %vm1495_vm15, %v1453_v3 }
 0x16f   : > { %v2301_v28 = vpop.f32.mrf.mxu0  ;;  %2328 = vmatmul.mubr.msk.bf16.gmra.mxu1 %vm1495_vm15, %v1461_v61  ;;  %v534_v31 = vpop.permute.xlu0 %533 }
 0x170   : > { %v550_v27 = vpop.permute.xlu1 %549  ;;  %v1575_v43 = vadd.f32 %v2301_v28, %v3654_v13  ;;  %v1168_v53 = vsel %vm1148_vm6, %v3138_v44, %v534_v31 }
 0x171   : > { %v1566_v46 = vpop.f32.mrf.mxu0  ;;  %v1184_v42 = vsel %vm1148_vm6, %v3135_v38, %v550_v27 }
 0x172   : > { %v1567_v56 = vadd.f32 %v3654_v13, %v1566_v46  ;;  %v1711_v62 = vmax.f32 %v1575_v43, 0.0 }
 0x173   : > { %v2302_v0 = vpop.f32.mrf.mxu0  ;;  %v609_v34 = vpop.permute.xlu0 %608 }
 0x174   : > { %v1578_v25 = vadd.f32 %v2302_v0, %v3654_v13  ;;  %v625_v11 = vpop.permute.xlu1 %624  ;;  %v1709_v45 = vmax.f32 %v1567_v56, 0.0  ;;  %v1203_v60 = vsel %vm1185_vm7, %v1166_v19, %v609_v34 }
 0x175   : > { %v1569_v20 = vpop.f32.mrf.mxu0  ;;  %v1219_v59 = vsel %vm1185_vm7, %v1182_v4, %v625_v11 }
 0x176   : > { %v1712_v16 = vmax.f32 %v1578_v25, 0.0  ;;  %v1570_v48 = vadd.f32 %v3654_v13, %v1569_v20 }
 0x177   : > { %v611_v12 = vpop.permute.xlu0 %610 }
 0x178   : > { %v2173_v39 = vpack.c.bf16 %v1712_v16, %v1711_v62  ;;  %v1710_v23 = vmax.f32 %v1570_v48, 0.0  ;;  %v627_v63 = vpop.permute.xlu1 %626  ;;  %v1205_v35 = vsel %vm1185_vm7, %v1168_v53, %v611_v12 }
 0x179   : > { %v1221_v10 = vsel %vm1185_vm7, %v1184_v42, %v627_v63 }
 0x17a   : > { %2255 = vst [vmem:[%s3665_s16 + $0x8] sm:$0xff] %v2173_v39   ;;  %v2168_v54 = vpack.c.bf16 %v1710_v23, %v1709_v45 }
 0x17b   : > { %v662_v24 = vpop.permute.xlu0 %661 }
 0x17c   : > { %2169 = vst [vmem:[%s3665_s16] sm:$0xff] %v2168_v54   ;;  %v678_v18 = vpop.permute.xlu1 %677  ;;  %v1240_v58 = vsel %vm1222_vm8, %v1203_v60, %v662_v24 }
 0x17d   : > { %v1256_v50 = vsel %vm1222_vm8, %v1219_v59, %v678_v18 }
 0x17f   : > { %v664_v5 = vpop.permute.xlu0 %663 }
 0x180   : > { %v680_v33 = vpop.permute.xlu1 %679  ;;  %v1242_v32 = vsel %vm1222_vm8, %v1205_v35, %v664_v5 }
 0x181   : > { %v1258_v61 = vsel %vm1222_vm8, %v1221_v10, %v680_v33 }
 0x183   : > { %v792_v6 = vpop.permute.xlu0 %791 }
 0x184   : > { %v808_v1 = vpop.permute.xlu1 %807  ;;  %v1277_v22 = vsel %vm1259_vm9, %v1240_v58, %v792_v6 }
 0x185   : > { %v1293_v29 = vsel %vm1259_vm9, %v1256_v50, %v808_v1 }
 0x187   : > { %v794_v2 = vpop.permute.xlu0 %793 }
 0x188   : > { %v810_v26 = vpop.permute.xlu1 %809  ;;  %v1279_v28 = vsel %vm1259_vm9, %v1242_v32, %v794_v2 }
 0x189   : > { %v1295_v46 = vsel %vm1259_vm9, %v1258_v61, %v810_v26 }
 0x18b   : > { %v869_v52 = vpop.permute.xlu0 %868 }
 0x18c   : > { %v885_v15 = vpop.permute.xlu1 %884  ;;  %v1314_v40 = vsel %vm1296_vm10, %v1277_v22, %v869_v52 }
 0x18d   : > { %v1330_v47 = vsel %vm1296_vm10, %v1293_v29, %v885_v15 }
 0x18f   : > { %v871_v14 = vpop.permute.xlu0 %870 }
 0x190   : > { %v887_v8 = vpop.permute.xlu1 %886  ;;  %v1316_v43 = vsel %vm1296_vm10, %v1279_v28, %v871_v14 }
 0x191   : > { %v1332_v56 = vsel %vm1296_vm10, %v1295_v46, %v887_v8 }
 0x193   : > { %v922_v51 = vpop.permute.xlu0 %921 }
 0x194   : > { %v938_v36 = vpop.permute.xlu1 %937  ;;  %v1351_v9 = vsel %vm1333_vm11, %v1314_v40, %v922_v51 }
 0x195   : > { %v1367_v17 = vsel %vm1333_vm11, %v1330_v47, %v938_v36 }
 0x197   : > { %v924_v30 = vpop.permute.xlu0 %923 }
 0x198   : > { %v940_v57 = vpop.permute.xlu1 %939  ;;  %v1353_v25 = vsel %vm1333_vm11, %v1316_v43, %v924_v30 }
 0x199   : > { %v1369_v20 = vsel %vm1333_vm11, %v1332_v56, %v940_v57 }
 0x19b   : > { %v1052_v7 = vpop.permute.xlu0 %1051 }
 0x19c   : > { %v1068_v55 = vpop.permute.xlu1 %1067  ;;  %v1388_v44 = vsel %vm1370_vm12, %v1351_v9, %v1052_v7 }
 0x19d   : > { %v1404_v38 = vsel %vm1370_vm12, %v1367_v17, %v1068_v55 }
 0x19f   : > { %v1054_v41 = vpop.permute.xlu0 %1053 }
 0x1a0   : > { %v1070_v21 = vpop.permute.xlu1 %1069  ;;  %v1390_v62 = vsel %vm1370_vm12, %v1353_v25, %v1054_v41 }
 0x1a1   : > { %v1406_v48 = vsel %vm1370_vm12, %v1369_v20, %v1070_v21 }
 0x1a3   : > { %v1129_v3 = vpop.permute.xlu0 %1128 }
 0x1a4   : > { %v1145_v31 = vpop.permute.xlu1 %1144  ;;  %v1425_v27 = vsel %vm1407_vm13, %v1388_v44, %v1129_v3 }
 0x1a5   : > { %v1441_v0 = vsel %vm1407_vm13, %v1404_v38, %v1145_v31  ;;  %v1454_v34 = vsel %vm1444_vm14, %v1425_v27, 0 }
 0x1a6   : > { %v1462_v11 = vsel %vm1444_vm14, %v1441_v0, 0  ;;  %2315 = vmatprep.mubr.msk.bf16.mxu0 %vm1495_vm15, %v1454_v34 }
 0x1a7   : > { %2331 = vmatprep.mubr.msk.bf16.mxu1 %vm1495_vm15, %v1462_v11  ;;  %v1131_v16 = vpop.permute.xlu0 %1130 }
 0x1a8   : > { %v1147_v12 = vpop.permute.xlu1 %1146  ;;  %v1427_v45 = vsel %vm1407_vm13, %v1390_v62, %v1131_v16 }
 0x1a9   : > { %v1443_v39 = vsel %vm1407_vm13, %v1406_v48, %v1147_v12  ;;  %v1455_v23 = vsel %vm1444_vm14, %v1427_v45, 0 }
 0x1aa   : > { %v1463_v63 = vsel %vm1444_vm14, %v1443_v39, 0  ;;  %2316 = vmatmul.mubr.msk.bf16.gmra.mxu0 %vm1495_vm15, %v1455_v23 }
 0x1ab   : > { %2332 = vmatmul.mubr.msk.bf16.gmra.mxu1 %vm1495_vm15, %v1463_v63 }
 0x1ae   : > { %v2305_v54 = vpop.f32.mrf.mxu0 }
 0x1af   : > { %v2321_v24 = vpop.f32.mrf.mxu1  ;;  %v1591_v5 = vadd.f32 %v2305_v54, %v3654_v13 }
 0x1b0   : > { %v1582_v18 = vpop.f32.mrf.mxu0  ;;  %v1655_v6 = vadd.f32 %v2321_v24, %v3654_v13 }
 0x1b1   : > { %v1646_v33 = vpop.f32.mrf.mxu1  ;;  %v1583_v2 = vadd.f32 %v3654_v13, %v1582_v18  ;;  %v1715_v51 = vmax.f32 %v1591_v5, 0.0 }
 0x1b2   : > { %v2306_v1 = vpop.f32.mrf.mxu0  ;;  %v1647_v15 = vadd.f32 %v3654_v13, %v1646_v33  ;;  %v1731_v7 = vmax.f32 %v1655_v6, 0.0 }
 0x1b3   : > { %v1594_v26 = vadd.f32 %v2306_v1, %v3654_v13  ;;  %v2322_v52 = vpop.f32.mrf.mxu1  ;;  %v1713_v19 = vmax.f32 %v1583_v2, 0.0 }
 0x1b4   : > { %v1658_v14 = vadd.f32 %v2322_v52, %v3654_v13  ;;  %v1585_v8 = vpop.f32.mrf.mxu0  ;;  %v1729_v60 = vmax.f32 %v1647_v15, 0.0 }
 0x1b5   : > { %v1716_v36 = vmax.f32 %v1594_v26, 0.0  ;;  %v1586_v30 = vadd.f32 %v3654_v13, %v1585_v8  ;;  %v1649_v57 = vpop.f32.mrf.mxu1 }
 0x1b6   : > { %v1732_v55 = vmax.f32 %v1658_v14, 0.0  ;;  %v1650_v49 = vadd.f32 %v3654_v13, %v1649_v57 }
 0x1b7   : > { %v2183_v37 = vpack.c.bf16 %v1716_v36, %v1715_v51  ;;  %v1714_v4 = vmax.f32 %v1586_v30, 0.0 }
 0x1b8   : > { %v2223_v59 = vpack.c.bf16 %v1732_v55, %v1731_v7  ;;  %v1730_v58 = vmax.f32 %v1650_v49, 0.0 }
 0x1b9   : > { %2257 = vst [vmem:[%s3665_s16 + $0x18] sm:$0xff] %v2183_v37   ;;  %v2178_v41 = vpack.c.bf16 %v1714_v4, %v1713_v19 }
 0x1ba   : > { %2265 = vst [vmem:[%s3665_s16 + $0x58] sm:$0xff] %v2223_v59   ;;  %v2218_v50 = vpack.c.bf16 %v1730_v58, %v1729_v60 }
 0x1bb   : > { %2256 = vst [vmem:[%s3665_s16 + $0x10] sm:$0xff] %v2178_v41  }
 0x1bc   : > { %2264 = vst [vmem:[%s3665_s16 + $0x50] sm:$0xff] %v2218_v50  }
 0x1ee   : > { %v2309_v22 = vpop.f32.mrf.mxu0 }
 0x1ef   : > { %v2325_v21 = vpop.f32.mrf.mxu1  ;;  %v1607_v29 = vadd.f32 %v2309_v22, %v3654_v13 }
 0x1f0   : > { %v1598_v53 = vpop.f32.mrf.mxu0  ;;  %v1671_v42 = vadd.f32 %v2325_v21, %v3654_v13 }
 0x1f1   : > { %v1662_v40 = vpop.f32.mrf.mxu1  ;;  %v1599_v47 = vadd.f32 %v3654_v13, %v1598_v53  ;;  %v1719_v3 = vmax.f32 %v1607_v29, 0.0 }
 0x1f2   : > { %v2310_v35 = vpop.f32.mrf.mxu0  ;;  %v1663_v32 = vadd.f32 %v3654_v13, %v1662_v40  ;;  %v1735_v31 = vmax.f32 %v1671_v42, 0.0 }
 0x1f3   : > { %v1610_v9 = vadd.f32 %v2310_v35, %v3654_v13  ;;  %v2326_v10 = vpop.f32.mrf.mxu1  ;;  %v1717_v43 = vmax.f32 %v1599_v47, 0.0 }
 0x1f4   : > { %v1674_v17 = vadd.f32 %v2326_v10, %v3654_v13  ;;  %v1601_v44 = vpop.f32.mrf.mxu0  ;;  %v1733_v56 = vmax.f32 %v1663_v32, 0.0 }
 0x1f5   : > { %v1720_v61 = vmax.f32 %v1610_v9, 0.0  ;;  %v1602_v28 = vadd.f32 %v3654_v13, %v1601_v44  ;;  %v1665_v38 = vpop.f32.mrf.mxu1 }
 0x1f6   : > { %v1736_v27 = vmax.f32 %v1674_v17, 0.0  ;;  %v1666_v46 = vadd.f32 %v3654_v13, %v1665_v38 }
 0x1f7   : > { %v2193_v0 = vpack.c.bf16 %v1720_v61, %v1719_v3  ;;  %v1718_v34 = vmax.f32 %v1602_v28, 0.0 }
 0x1f8   : > { %v2233_v25 = vpack.c.bf16 %v1736_v27, %v1735_v31  ;;  %v1734_v11 = vmax.f32 %v1666_v46, 0.0 }
 0x1f9   : > { %2259 = vst [vmem:[%s3665_s16 + $0x28] sm:$0xff] %v2193_v0   ;;  %v2188_v20 = vpack.c.bf16 %v1718_v34, %v1717_v43 }
 0x1fa   : > { %2267 = vst [vmem:[%s3665_s16 + $0x68] sm:$0xff] %v2233_v25   ;;  %v2228_v62 = vpack.c.bf16 %v1734_v11, %v1733_v56 }
 0x1fb   : > { %2258 = vst [vmem:[%s3665_s16 + $0x20] sm:$0xff] %v2188_v20  }
 0x1fc   : > { %2266 = vst [vmem:[%s3665_s16 + $0x60] sm:$0xff] %v2228_v62  }
 0x22e   : > { %v2313_v16 = vpop.f32.mrf.mxu0 }
 0x22f   : > { %v2329_v48 = vpop.f32.mrf.mxu1  ;;  %v1623_v45 = vadd.f32 %v2313_v16, %v3654_v13 }
 0x230   : > { %v1614_v12 = vpop.f32.mrf.mxu0  ;;  %v1687_v23 = vadd.f32 %v2329_v48, %v3654_v13 }
 0x231   : > { %v1678_v39 = vpop.f32.mrf.mxu1  ;;  %v1615_v54 = vadd.f32 %v3654_v13, %v1614_v12  ;;  %v1723_v1 = vmax.f32 %v1623_v45, 0.0 }
 0x232   : > { %v2314_v63 = vpop.f32.mrf.mxu0  ;;  %v1679_v5 = vadd.f32 %v3654_v13, %v1678_v39  ;;  %v1739_v15 = vmax.f32 %v1687_v23, 0.0 }
 0x233   : > { %v1626_v24 = vadd.f32 %v2314_v63, %v3654_v13  ;;  %v2330_v18 = vpop.f32.mrf.mxu1  ;;  %v1721_v51 = vmax.f32 %v1615_v54, 0.0 }
 0x234   : > { %v1690_v33 = vadd.f32 %v2330_v18, %v3654_v13  ;;  %v1617_v6 = vpop.f32.mrf.mxu0  ;;  %v1737_v57 = vmax.f32 %v1679_v5, 0.0 }
 0x235   : > { %v1724_v2 = vmax.f32 %v1626_v24, 0.0  ;;  %v1618_v26 = vadd.f32 %v3654_v13, %v1617_v6  ;;  %v1681_v52 = vpop.f32.mrf.mxu1 }
 0x236   : > { %v1740_v14 = vmax.f32 %v1690_v33, 0.0  ;;  %v1682_v8 = vadd.f32 %v3654_v13, %v1681_v52 }
 0x237   : > { %v2203_v36 = vpack.c.bf16 %v1724_v2, %v1723_v1  ;;  %v1722_v30 = vmax.f32 %v1618_v26, 0.0 }
 0x238   : > { %v2243_v7 = vpack.c.bf16 %v1740_v14, %v1739_v15  ;;  %v1738_v55 = vmax.f32 %v1682_v8, 0.0 }
 0x239   : > { %2261 = vst [vmem:[%s3665_s16 + $0x38] sm:$0xff] %v2203_v36   ;;  %v2198_v49 = vpack.c.bf16 %v1722_v30, %v1721_v51 }
 0x23a   : > { %2269 = vst [vmem:[%s3665_s16 + $0x78] sm:$0xff] %v2243_v7   ;;  %v2238_v19 = vpack.c.bf16 %v1738_v55, %v1737_v57 }
 0x23b   : > { %2260 = vst [vmem:[%s3665_s16 + $0x30] sm:$0xff] %v2198_v49  }
 0x23c   : > { %2268 = vst [vmem:[%s3665_s16 + $0x70] sm:$0xff] %v2238_v19  }
 0x26a   : > { %v2317_v37 = vpop.f32.mrf.mxu0 }
 0x26b   : > { %v2333_v4 = vpop.f32.mrf.mxu1  ;;  %v1639_v59 = vadd.f32 %v2317_v37, %v3654_v13 }
 0x26c   : > { %v1630_v60 = vpop.f32.mrf.mxu0  ;;  %v1703_v41 = vadd.f32 %v2333_v4, %v3654_v13 }
 0x26d   : > { %v1694_v58 = vpop.f32.mrf.mxu1  ;;  %v1631_v22 = vadd.f32 %v3654_v13, %v1630_v60  ;;  %v1727_v35 = vmax.f32 %v1639_v59, 0.0 }
 0x26e   : > { %v2318_v50 = vpop.f32.mrf.mxu0  ;;  %v1695_v29 = vadd.f32 %v3654_v13, %v1694_v58  ;;  %v1743_v32 = vmax.f32 %v1703_v41, 0.0 }
 0x26f   : > { %v1642_v21 = vadd.f32 %v2318_v50, %v3654_v13  ;;  %v2334_v53 = vpop.f32.mrf.mxu1  ;;  %v1725_v3 = vmax.f32 %v1631_v22, 0.0 }
 0x270   : > { %v1706_v40 = vadd.f32 %v2334_v53, %v3654_v13  ;;  %v1633_v42 = vpop.f32.mrf.mxu0  ;;  %v1741_v38 = vmax.f32 %v1695_v29, 0.0 }
 0x271   : > { %v1728_v47 = vmax.f32 %v1642_v21, 0.0  ;;  %v1634_v9 = vadd.f32 %v3654_v13, %v1633_v42  ;;  %v1697_v10 = vpop.f32.mrf.mxu1 }
 0x272   : > { %v1744_v17 = vmax.f32 %v1706_v40, 0.0  ;;  %v1698_v44 = vadd.f32 %v3654_v13, %v1697_v10 }
 0x273   : > { %v2213_v61 = vpack.c.bf16 %v1728_v47, %v1727_v35  ;;  %v1726_v28 = vmax.f32 %v1634_v9, 0.0 }
 0x274   : > { %v2253_v31 = vpack.c.bf16 %v1744_v17, %v1743_v32  ;;  %v1742_v27 = vmax.f32 %v1698_v44, 0.0 }
 0x275   : > { %2263 = vst [vmem:[%s3665_s16 + $0x48] sm:$0xff] %v2213_v61   ;;  %v2208_v46 = vpack.c.bf16 %v1726_v28, %v1725_v3 }
 0x276   : > { %2271 = vst [vmem:[%s3665_s16 + $0x88] sm:$0xff] %v2253_v31   ;;  %v2248_v43 = vpack.c.bf16 %v1742_v27, %v1741_v38 }
 0x277   : > { %2262 = vst [vmem:[%s3665_s16 + $0x40] sm:$0xff] %v2208_v46  }
 0x278   : > { %2270 = vst [vmem:[%s3665_s16 + $0x80] sm:$0xff] %v2248_v43  }
 0x279 PF: > { %s13_s14 = sadd.s32 1, %s2443_s14   ;;  %s3843_s12 = smov %s2439_s13 }
 0x27a   : > { %p10_p5 = scmp.ge.s32.totalorder %s13_s14, 4   ;;  %s3844_s13 = smov %s3846_s15 }
 0x27c   :  { %12 = sbr.rel (!%p10_p5) target bundleno = 2 (0x2), region = 68 }

</bundles_post_ra>
